<compile_context>
chip_gen: v7x
topology: tpu7x:2x2x1
jax: 0.10.0
libtpu: 0.0.40
codegen_flags: <defaults>
</compile_context>

<pallas_src>
import functools

import jax
import jax.numpy as jnp
from jax.experimental import pallas as pl
from jax.experimental.pallas import tpu as pltpu


# ----------------------------------------------------------------------------
# Pallas kernel (one Cout tile per grid step)
# ----------------------------------------------------------------------------
def _fusion_kernel(x1_ref, x2_ref, w_ref, gb_ref, o_ref, *, n_batch, inv_count, eps):
    """conv1x1(cat(x1, x2)) -> batch-stats BN -> ReLU, NCHW layout.

    x1_ref: (N, C1, HW) f32     x2_ref: (N, C2, HW) f32
    w_ref : (tn, C1+C2) bf16    1x1 conv weight tile (concat along K is implicit)
    gb_ref: (tn, 2)     f32     col 0 = gamma, col 1 = beta
    o_ref : (N, tn, HW) f32
    """
    tn = o_ref.shape[1]
    w = w_ref[...]                                              # (tn, C1+C2) bf16
    unroll = n_batch <= 8

    def conv_body(n, carry):
        s1, s2 = carry
        # torch.cat((x1, x2), dim=1): concat along the contraction dim, in VMEM,
        # so the MXU sees a single K = C1+C2 contraction.
        xcat = jnp.concatenate(
            [x1_ref[n].astype(jnp.bfloat16), x2_ref[n].astype(jnp.bfloat16)],
            axis=0)                                             # (C1+C2, HW)
        y = jnp.dot(w, xcat, preferred_element_type=jnp.float32)  # (tn, HW) f32
        o_ref[n] = y                                            # stage pre-BN conv out
        # One-pass stats: per-channel sum and sum-of-squares over batch & H*W.
        s1 = s1 + jnp.sum(y, axis=1, keepdims=True)
        s2 = s2 + jnp.sum(y * y, axis=1, keepdims=True)
        return s1, s2

    zero = jnp.zeros((tn, 1), jnp.float32)
    s1, s2 = jax.lax.fori_loop(0, n_batch, conv_body, (zero, zero), unroll=unroll)

    mean = s1 * inv_count
    var = s2 * inv_count - mean * mean                          # biased batch variance
    gb = gb_ref[...]                                            # (tn, 2)
    scale = gb[:, 0:1] * jax.lax.rsqrt(var + eps)               # (tn, 1)
    shift = gb[:, 1:2] - mean * scale                           # (tn, 1)

    def norm_body(n, _):
        o_ref[n] = jnp.maximum(o_ref[n] * scale + shift, 0.0)   # BN affine + ReLU
        return 0

    jax.lax.fori_loop(0, n_batch, norm_body, 0, unroll=unroll)


# ----------------------------------------------------------------------------
# Wrapper
# ----------------------------------------------------------------------------
def fusion_block(x1, x2, w, b, gamma, beta, *, eps=1e-5):
    """FusionBlock forward (PyTorch semantics, BatchNorm2d in training mode).

    x1: (N, C1, H, W), x2: (N, C2, H, W)       float, NCHW (as in PyTorch)
    w : (Cout, C1+C2) or (Cout, C1+C2, 1, 1)   1x1 conv weight
    b : (Cout,)  conv bias -- exactly cancelled by batch-stats BN, not used
    gamma, beta: (Cout,)  BN affine parameters
    returns: (N, Cout, H, W) float32
    """
    del b  # (y + b) - mean(y + b) == y - mean(y): bias is a no-op under training BN
    N, C1, H, W = x1.shape
    _, C2, _, _ = x2.shape
    Cin = C1 + C2
    HW = H * W
    w2d = jnp.asarray(w).reshape(-1, Cin)
    Cout = w2d.shape[0]

    # Only free reshapes -- no transpose/cast passes over the activations in HBM.
    x1r = x1.reshape(N, C1, HW)
    x2r = x2.reshape(N, C2, HW)
    wb = w2d.astype(jnp.bfloat16)                               # (Cout, Cin)
    gb = jnp.stack([gamma, beta], axis=1).astype(jnp.float32)   # (Cout, 2)

    # Cout tiling: 2 "parallel" tiles when possible so both v7x TensorCores get
    # work; on single-TC chips the extra grid step costs ~0.35 us (negligible).
    if Cout % 16 == 0:
        tn, n_tiles = Cout // 2, 2
    else:
        tn, n_tiles = Cout, 1

    # TODO(synk): batch-stats BN needs all N*H*W positions in one block; very
    # large inputs need a two-pass (stats kernel + normalize kernel) variant
    # tiled over N*H*W -- the single-block design binds first on v7x (64 MiB
    # physical VMEM) and v5e (16 MiB default scoped limit).
    blk_bytes = (2 * N * Cin * HW * 4          # f32 activations, double-buffered
                 + 2 * tn * Cin * 2            # bf16 weight tile
                 + 2 * tn * 8 * 4              # gamma/beta tile (padded)
                 + 2 * N * tn * HW * 4)        # f32 output tile, double-buffered
    vmem_limit = int(min(max(1.5 * blk_bytes, 32 * 1024 * 1024), 100 * 1024 * 1024))

    # TODO(synk): mark the grid-invariant activation specs with
    # pipeline_mode=pl.Buffered(1) to drop their second pipeline buffer once
    # buffer_count=1 is confirmed supported in this JAX version.
    kernel = functools.partial(_fusion_kernel, n_batch=N,
                               inv_count=1.0 / float(N * HW), eps=float(eps))
    out = pl.pallas_call(
        kernel,
        out_shape=jax.ShapeDtypeStruct((N, Cout, HW), jnp.float32),
        grid_spec=pltpu.PrefetchScalarGridSpec(
            num_scalar_prefetch=0,
            grid=(n_tiles,),
            in_specs=[
                pl.BlockSpec((N, C1, HW), lambda j: (0, 0, 0)),  # resident across j
                pl.BlockSpec((N, C2, HW), lambda j: (0, 0, 0)),
                pl.BlockSpec((tn, Cin), lambda j: (j, 0)),       # weight tile
                pl.BlockSpec((tn, 2), lambda j: (j, 0)),         # gamma/beta tile
            ],
            out_specs=pl.BlockSpec((N, tn, HW), lambda j: (0, j, 0)),
        ),
        compiler_params=pltpu.CompilerParams(
            dimension_semantics=("parallel",),
            vmem_limit_bytes=vmem_limit,
        ),
    )(x1r, x2r, wb, gb)

    return out.reshape(N, Cout, H, W)


# ----------------------------------------------------------------------------
# Pure-JAX reference (bf16 matmul numerics, f32 epilogue, bias included)
# ----------------------------------------------------------------------------
def _reference(x1, x2, w, b, gamma, beta, eps=1e-5):
    xcat = jnp.concatenate([x1, x2], axis=1)                    # (N, Cin, H, W)
    N, Cin, H, W = xcat.shape
    Cout = w.shape[0]
    xm = xcat.reshape(N, Cin, H * W).astype(jnp.bfloat16)
    wm = jnp.asarray(w).reshape(Cout, Cin).astype(jnp.bfloat16)
    y = jnp.einsum('ok,nkl->nol', wm, xm,
                   preferred_element_type=jnp.float32)          # (N, Cout, HW)
    y = y + b.reshape(1, Cout, 1)                               # conv bias
    mean = jnp.mean(y, axis=(0, 2), keepdims=True)              # training-mode BN
    var = jnp.mean((y - mean) ** 2, axis=(0, 2), keepdims=True)  # biased variance
    y = ((y - mean) * jax.lax.rsqrt(var + eps) * gamma.reshape(1, Cout, 1)
         + beta.reshape(1, Cout, 1))
    return jnp.maximum(y, 0.0).reshape(N, Cout, H, W)


if __name__ == "__main__":
    key = jax.random.PRNGKey(0)
    k1, k2, kw, kb, kg, kbe = jax.random.split(key, 6)

    # Small NCHW feature maps to fuse (matches the PyTorch module's forward).
    N, C1, C2, H, W, Cout = 2, 64, 64, 16, 16, 256
    x1 = jax.random.normal(k1, (N, C1, H, W), jnp.float32)
    x2 = jax.random.normal(k2, (N, C2, H, W), jnp.float32)

    fan_in = C1 + C2
    bound = 1.0 / (fan_in ** 0.5)
    w = jax.random.uniform(kw, (Cout, fan_in), jnp.float32, -bound, bound)
    b = jax.random.uniform(kb, (Cout,), jnp.float32, -bound, bound)
    gamma = 1.0 + 0.1 * jax.random.normal(kg, (Cout,), jnp.float32)
    beta = 0.1 * jax.random.normal(kbe, (Cout,), jnp.float32)

    out = jax.block_until_ready(fusion_block(x1, x2, w, b, gamma, beta))

    assert out.shape == (N, Cout, H, W), out.shape
    assert bool(jnp.all(jnp.isfinite(out)))

    ref = _reference(x1, x2, w, b, gamma, beta)
    max_err = float(jnp.max(jnp.abs(out - ref)))
    assert bool(jnp.allclose(out, ref, rtol=5e-3, atol=5e-3)), max_err

    print("KERNEL_OK")
</pallas_src>

<mosaic_0001>
module attributes {stable_mosaic.version = 11 : i64} {
  func.func @_fusion_kernel(%arg0: i32, %arg1: memref<2x64x256xf32, #tpu.memory_space<vmem>>, %arg2: memref<2x64x256xf32, #tpu.memory_space<vmem>>, %arg3: memref<128x128xbf16, #tpu.memory_space<vmem>>, %arg4: memref<128x2xf32, #tpu.memory_space<vmem>>, %arg5: memref<2x128x256xf32, #tpu.memory_space<vmem>>) attributes {dimension_semantics = [#tpu.dimension_semantics<parallel>], iteration_bounds = array<i64: 2>, scalar_prefetch = 0 : i64, scratch_operands = 0 : i64, tpu.core_type = #tpu.core_type<tc>, window_params = [{pipeline_mode = #tpu.pipeline_mode<synchronous>, transform_indices = @transform_0, window_bounds = array<i64: 2, 64, 256>}, {pipeline_mode = #tpu.pipeline_mode<synchronous>, transform_indices = @transform_1, window_bounds = array<i64: 2, 64, 256>}, {transform_indices = @transform_2, window_bounds = array<i64: 128, 128>}, {transform_indices = @transform_3, window_bounds = array<i64: 128, 2>}, {transform_indices = @transform_4, window_bounds = array<i64: 2, 128, 256>}]} {
    %c0 = arith.constant 0 : index
    %c0_0 = arith.constant 0 : index
    %0 = vector.load %arg3[%c0, %c0_0] : memref<128x128xbf16, #tpu.memory_space<vmem>>, vector<128x128xbf16>
    %cst = arith.constant 0.000000e+00 : f32
    %1 = vector.broadcast %cst : f32 to vector<128x1xf32>
    %c0_i32 = arith.constant 0 : i32
    %2 = arith.index_cast %c0_i32 : i32 to index
    %c0_1 = arith.constant 0 : index
    %c0_2 = arith.constant 0 : index
    %3 = vector.load %arg1[%2, %c0_1, %c0_2] : memref<2x64x256xf32, #tpu.memory_space<vmem>>, vector<1x64x256xf32>
    %4 = vector.shape_cast %3 : vector<1x64x256xf32> to vector<64x256xf32>
    %5 = arith.truncf %4 : vector<64x256xf32> to vector<64x256xbf16>
    %6 = arith.index_cast %c0_i32 : i32 to index
    %c0_3 = arith.constant 0 : index
    %c0_4 = arith.constant 0 : index
    %7 = vector.load %arg2[%6, %c0_3, %c0_4] : memref<2x64x256xf32, #tpu.memory_space<vmem>>, vector<1x64x256xf32>
    %8 = vector.shape_cast %7 : vector<1x64x256xf32> to vector<64x256xf32>
    %9 = arith.truncf %8 : vector<64x256xf32> to vector<64x256xbf16>
    %10 = tpu.concatenate %5, %9 in 0 : vector<64x256xbf16>, vector<64x256xbf16> -> vector<128x256xbf16>
    %cst_5 = arith.constant dense<0.000000e+00> : vector<128x256xf32>
    %11 = tpu.matmul %0, %10, %cst_5 {dimension_numbers = #tpu.dot_dimension_numbers<[1], [0], [0], [1], [0, 0, 1, 1], [], []>} : vector<128x128xbf16>, vector<128x256xbf16>, vector<128x256xf32> -> vector<128x256xf32>
    %12 = arith.index_cast %c0_i32 : i32 to index
    %c0_6 = arith.constant 0 : index
    %c0_7 = arith.constant 0 : index
    %13 = vector.load %arg5[%12, %c0_6, %c0_7] : memref<2x128x256xf32, #tpu.memory_space<vmem>>, vector<1x128x256xf32>
    %14 = vector.shape_cast %13 : vector<1x128x256xf32> to vector<128x256xf32>
    %15 = vector.shape_cast %11 : vector<128x256xf32> to vector<1x128x256xf32>
    tpu.vector_store %arg5[%12, %c0_6, %c0_7], %15 {strides = array<i32>} : memref<2x128x256xf32, #tpu.memory_space<vmem>>, vector<1x128x256xf32>,
    %cst_8 = arith.constant dense<0.000000e+00> : vector<128xf32>
    %16 = vector.multi_reduction <add>, %11, %cst_8 [1] : vector<128x256xf32> to vector<128xf32>
    %17 = vector.shape_cast %16 : vector<128xf32> to vector<128x1xf32>
    %18 = arith.addf %1, %17 : vector<128x1xf32>
    %19 = arith.mulf %11, %11 : vector<128x256xf32>
    %cst_9 = arith.constant dense<0.000000e+00> : vector<128xf32>
    %20 = vector.multi_reduction <add>, %19, %cst_9 [1] : vector<128x256xf32> to vector<128xf32>
    %21 = vector.shape_cast %20 : vector<128xf32> to vector<128x1xf32>
    %22 = arith.addf %1, %21 : vector<128x1xf32>
    %c1_i32 = arith.constant 1 : i32
    %23 = arith.index_cast %c1_i32 : i32 to index
    %c0_10 = arith.constant 0 : index
    %c0_11 = arith.constant 0 : index
    %24 = vector.load %arg1[%23, %c0_10, %c0_11] : memref<2x64x256xf32, #tpu.memory_space<vmem>>, vector<1x64x256xf32>
    %25 = vector.shape_cast %24 : vector<1x64x256xf32> to vector<64x256xf32>
    %26 = arith.truncf %25 : vector<64x256xf32> to vector<64x256xbf16>
    %27 = arith.index_cast %c1_i32 : i32 to index
    %c0_12 = arith.constant 0 : index
    %c0_13 = arith.constant 0 : index
    %28 = vector.load %arg2[%27, %c0_12, %c0_13] : memref<2x64x256xf32, #tpu.memory_space<vmem>>, vector<1x64x256xf32>
    %29 = vector.shape_cast %28 : vector<1x64x256xf32> to vector<64x256xf32>
    %30 = arith.truncf %29 : vector<64x256xf32> to vector<64x256xbf16>
    %31 = tpu.concatenate %26, %30 in 0 : vector<64x256xbf16>, vector<64x256xbf16> -> vector<128x256xbf16>
    %cst_14 = arith.constant dense<0.000000e+00> : vector<128x256xf32>
    %32 = tpu.matmul %0, %31, %cst_14 {dimension_numbers = #tpu.dot_dimension_numbers<[1], [0], [0], [1], [0, 0, 1, 1], [], []>} : vector<128x128xbf16>, vector<128x256xbf16>, vector<128x256xf32> -> vector<128x256xf32>
    %33 = arith.index_cast %c1_i32 : i32 to index
    %c0_15 = arith.constant 0 : index
    %c0_16 = arith.constant 0 : index
    %34 = vector.load %arg5[%33, %c0_15, %c0_16] : memref<2x128x256xf32, #tpu.memory_space<vmem>>, vector<1x128x256xf32>
    %35 = vector.shape_cast %34 : vector<1x128x256xf32> to vector<128x256xf32>
    %36 = vector.shape_cast %32 : vector<128x256xf32> to vector<1x128x256xf32>
    tpu.vector_store %arg5[%33, %c0_15, %c0_16], %36 {strides = array<i32>} : memref<2x128x256xf32, #tpu.memory_space<vmem>>, vector<1x128x256xf32>,
    %cst_17 = arith.constant dense<0.000000e+00> : vector<128xf32>
    %37 = vector.multi_reduction <add>, %32, %cst_17 [1] : vector<128x256xf32> to vector<128xf32>
    %38 = vector.shape_cast %37 : vector<128xf32> to vector<128x1xf32>
    %39 = arith.addf %18, %38 : vector<128x1xf32>
    %40 = arith.mulf %32, %32 : vector<128x256xf32>
    %cst_18 = arith.constant dense<0.000000e+00> : vector<128xf32>
    %41 = vector.multi_reduction <add>, %40, %cst_18 [1] : vector<128x256xf32> to vector<128xf32>
    %42 = vector.shape_cast %41 : vector<128xf32> to vector<128x1xf32>
    %43 = arith.addf %22, %42 : vector<128x1xf32>
    %c2_i32 = arith.constant 2 : i32
    %cst_19 = arith.constant 0.001953125 : f32
    %44 = vector.broadcast %cst_19 : f32 to vector<128x1xf32>
    %45 = arith.mulf %39, %44 : vector<128x1xf32>
    %cst_20 = arith.constant 0.001953125 : f32
    %46 = vector.broadcast %cst_20 : f32 to vector<128x1xf32>
    %47 = arith.mulf %43, %46 : vector<128x1xf32>
    %48 = arith.mulf %45, %45 : vector<128x1xf32>
    %49 = arith.subf %47, %48 : vector<128x1xf32>
    %c0_21 = arith.constant 0 : index
    %c0_22 = arith.constant 0 : index
    %50 = vector.load %arg4[%c0_21, %c0_22] : memref<128x2xf32, #tpu.memory_space<vmem>>, vector<128x2xf32>
    %51 = vector.extract_strided_slice %50 {offsets = [0, 0], sizes = [128, 1], strides = [1, 1]} : vector<128x2xf32> to vector<128x1xf32>
    %cst_23 = arith.constant 9.99999974E-6 : f32
    %52 = vector.broadcast %cst_23 : f32 to vector<128x1xf32>
    %53 = arith.addf %49, %52 : vector<128x1xf32>
    %54 = math.rsqrt %53 : vector<128x1xf32>
    %55 = arith.mulf %51, %54 : vector<128x1xf32>
    %56 = vector.extract_strided_slice %50 {offsets = [0, 1], sizes = [128, 1], strides = [1, 1]} : vector<128x2xf32> to vector<128x1xf32>
    %57 = arith.mulf %45, %55 : vector<128x1xf32>
    %58 = arith.subf %56, %57 : vector<128x1xf32>
    %c0_i32_24 = arith.constant 0 : i32
    %59 = arith.index_cast %c0_i32_24 : i32 to index
    %c0_25 = arith.constant 0 : index
    %c0_26 = arith.constant 0 : index
    %60 = vector.load %arg5[%59, %c0_25, %c0_26] : memref<2x128x256xf32, #tpu.memory_space<vmem>>, vector<1x128x256xf32>
    %61 = vector.shape_cast %60 : vector<1x128x256xf32> to vector<128x256xf32>
    %62 = vector.broadcast %55 : vector<128x1xf32> to vector<128x256xf32>
    %63 = arith.mulf %61, %62 : vector<128x256xf32>
    %64 = vector.broadcast %58 : vector<128x1xf32> to vector<128x256xf32>
    %65 = arith.addf %63, %64 : vector<128x256xf32>
    %cst_27 = arith.constant 0.000000e+00 : f32
    %66 = vector.broadcast %cst_27 : f32 to vector<128x256xf32>
    %67 = arith.maximumf %65, %66 : vector<128x256xf32>
    %68 = arith.index_cast %c0_i32_24 : i32 to index
    %c0_28 = arith.constant 0 : index
    %c0_29 = arith.constant 0 : index
    %69 = vector.load %arg5[%68, %c0_28, %c0_29] : memref<2x128x256xf32, #tpu.memory_space<vmem>>, vector<1x128x256xf32>
    %70 = vector.shape_cast %69 : vector<1x128x256xf32> to vector<128x256xf32>
    %71 = vector.shape_cast %67 : vector<128x256xf32> to vector<1x128x256xf32>
    tpu.vector_store %arg5[%68, %c0_28, %c0_29], %71 {strides = array<i32>} : memref<2x128x256xf32, #tpu.memory_space<vmem>>, vector<1x128x256xf32>,
    %c1_i32_30 = arith.constant 1 : i32
    %72 = arith.index_cast %c1_i32_30 : i32 to index
    %c0_31 = arith.constant 0 : index
    %c0_32 = arith.constant 0 : index
    %73 = vector.load %arg5[%72, %c0_31, %c0_32] : memref<2x128x256xf32, #tpu.memory_space<vmem>>, vector<1x128x256xf32>
    %74 = vector.shape_cast %73 : vector<1x128x256xf32> to vector<128x256xf32>
    %75 = vector.broadcast %55 : vector<128x1xf32> to vector<128x256xf32>
    %76 = arith.mulf %74, %75 : vector<128x256xf32>
    %77 = vector.broadcast %58 : vector<128x1xf32> to vector<128x256xf32>
    %78 = arith.addf %76, %77 : vector<128x256xf32>
    %cst_33 = arith.constant 0.000000e+00 : f32
    %79 = vector.broadcast %cst_33 : f32 to vector<128x256xf32>
    %80 = arith.maximumf %78, %79 : vector<128x256xf32>
    %81 = arith.index_cast %c1_i32_30 : i32 to index
    %c0_34 = arith.constant 0 : index
    %c0_35 = arith.constant 0 : index
    %82 = vector.load %arg5[%81, %c0_34, %c0_35] : memref<2x128x256xf32, #tpu.memory_space<vmem>>, vector<1x128x256xf32>
    %83 = vector.shape_cast %82 : vector<1x128x256xf32> to vector<128x256xf32>
    %84 = vector.shape_cast %80 : vector<128x256xf32> to vector<1x128x256xf32>
    tpu.vector_store %arg5[%81, %c0_34, %c0_35], %84 {strides = array<i32>} : memref<2x128x256xf32, #tpu.memory_space<vmem>>, vector<1x128x256xf32>,
    %c2_i32_36 = arith.constant 2 : i32
    return
  }
  func.func @transform_0(%arg0: i32) -> (i32, i32, i32) {
    %c0_i32 = arith.constant 0 : i32
    %c0_i32_0 = arith.constant 0 : i32
    %c0_i32_1 = arith.constant 0 : i32
    %c0_i32_2 = arith.constant 0 : i32
    return %c0_i32, %c0_i32_0, %c0_i32_1 : i32, i32, i32
  }
  func.func @transform_1(%arg0: i32) -> (i32, i32, i32) {
    %c0_i32 = arith.constant 0 : i32
    %c0_i32_0 = arith.constant 0 : i32
    %c0_i32_1 = arith.constant 0 : i32
    %c0_i32_2 = arith.constant 0 : i32
    return %c0_i32, %c0_i32_0, %c0_i32_1 : i32, i32, i32
  }
  func.func @transform_2(%arg0: i32) -> (i32, i32) {
    %c0_i32 = arith.constant 0 : i32
    %c0_i32_0 = arith.constant 0 : i32
    return %arg0, %c0_i32 : i32, i32
  }
  func.func @transform_3(%arg0: i32) -> (i32, i32) {
    %c0_i32 = arith.constant 0 : i32
    %c0_i32_0 = arith.constant 0 : i32
    return %arg0, %c0_i32 : i32, i32
  }
  func.func @transform_4(%arg0: i32) -> (i32, i32, i32) {
    %c0_i32 = arith.constant 0 : i32
    %c0_i32_0 = arith.constant 0 : i32
    %c0_i32_1 = arith.constant 0 : i32
    return %c0_i32, %arg0, %c0_i32_0 : i32, i32, i32
  }
}

</mosaic_0001>

<bundles_post_ra>
// kernel: tpu_custom_call.1
= control target key start
LH: loop header
LB: loop body
LE: loop exit
PB: predicated region body
PF: predicated region fallthrough
CT: control target
= control target key end

     0   :  { %9 = vsyncpa [#allocation3], 0  ;;  %s3144_s0 = inlined_call_operand.vmem [shape: f32[2,64,256], index: 0, kind: input, shape index: {}]   ;;  %s3145_s1 = inlined_call_operand.hbm [shape: f32[2,64,256], index: 1, kind: input, shape index: {}]   ;;  %s3146_s2 = inlined_call_operand.hbm [shape: bf16[256,128], index: 2, kind: input, shape index: {}]   ;;  %s3147_s3 = inlined_call_operand.vmem [shape: f32[256,2], index: 3, kind: input, shape index: {}]   ;;  %s3148_s4 = inlined_call_operand.hbm [shape: f32[2,256,256], index: 4, kind: output, shape index: {}]  }
   0x1   :  { %10 = vsyncpa [#allocation6], 0 }
   0x2   :  { %12 = vsyncpa [#allocation6 + $0x1], 0 }
   0x3   :  { %13 = vsyncpa [#allocation4], 0 }
   0x4   :  { %15 = vsyncpa [#allocation4 + $0x1], 0  ;;  %s2278_s15 = smov 0   ;;  %s2280_s16 = smov 0  }
   0x5   :  { %s2282_s17 = smov 0   ;;  %s2284_s18 = smov 0  }
   0x6 LB: > { %s2299_s19 = sadd.s32 4294967295, %s2236_s18   ;;  %s1874_s20 = sadd.s32 4294967294, %s2236_s18   ;;  %s2236_s18 = sphi %s2284_s18, %s3168_s18   ;;  %s2232_s17 = sphi %s2282_s17, %s3167_s17   ;;  %s2228_s16 = sphi %s2280_s16, %s3166_s16   ;;  %s2224_s15 = sphi %s2278_s15, %s3165_s15  }
   0x7   : > { %p83_p0 = scmp.ne.s32.totalorder %s2228_s16, %s2224_s15  ;;  %p3149_p1 = scmp.eq.s32.totalorder %s2299_s19, 0 }
   0x8   : > { %p139_p3 = scmp.eq.s32.totalorder %s1874_s20, 1  ;;  %p1875_p5 = scmp.ge.s32.totalorder %s2236_s18, 1 }
   0x9   : > { %p2308_p4 = por %p3149_p1, %p83_p0  ;;  %p146_p7 = scmp.lt.s32.totalorder %s2236_s18, 3 }
   0xa   : > { %p2313_p6 = por %p139_p3, %p83_p0  ;;  %s2238_s24 = smov [#allocation2]  }
   0xb   : > { %s3152_s21 = scalar_select %p2308_p4, 1, 0 }
   0xc   : > { %s3153_s22 = scalar_select %p2313_p6, 1, 0 }
   0xd   : > { %p2318_p8 = pnand %p1875_p5, %p146_p7  ;;  %s161_s25 = sshll.u32 %s2238_s24, 4  ;;  %s2322_s25 = int_to_ptr.vmem [resolvable:$true] %s161_s25 }
   0xe   : > { %s2334_s27 = sadd.s32 1, %s2236_s18   ;;  %s70_s28 = sadd.s32 1, %s2232_s17 }
   0xf   : > { %s3154_s23 = scalar_select %p2318_p8, 1, 0 }
  0x10   : > { %p2030_p9 = pneg %p2318_p8  ;;  %s67_s29 = ssub.s32 %s2236_s18, %s2334_s27 }
  0x11   : > { %s2136_s6 = scalar_lea.hbm %s3145_s1, 4096 }
  0x12   : > { %p2329_p11 = pnand %p2030_p9, %p3149_p1  ;;  %p2137_p12 = scmp.ne.s32.totalorder %s3145_s1, %s2136_s6 }
  0x13   : > { %p2143_p5 = scmp.lt.u32.totalorder %s2136_s6, %s3145_s1 }
  0x14   : > { %p2138_p13 = pneg %p2329_p11 }
  0x16   : > { %p2139_p0 = pnand %p2138_p13, %p2137_p12 }
  0x18   : > { %p2140_p3 = pneg %p2139_p0 }
  0x1a   : > { %p2145_p7 = pnand %p2143_p5, %p2140_p3 }
  0x1c   : > { %2148 = shalt.err (!%p2145_p7)
}
  0x1d   : > { %s2149_s11 = scalar_lea.vmem %s2322_s25, 4096  ;;  %p2157_p2 = scmp.lt.s32.totalorder %s2322_s25, %s2322_s25 }
  0x1e   : > { %p2150_p9 = scmp.ne.s32.totalorder %s2322_s25, %s2149_s11  ;;  %p2158_p6 = scmp.lt.s32.totalorder %s2149_s11, %s2149_s11 }
  0x20   : > { %p2152_p10 = pnand %p2150_p9, %p2138_p13  ;;  %p2159_p4 = por %p2158_p6, %p2157_p2 }
  0x22   : > { %p2153_p1 = pneg %p2152_p10 }
  0x24   : > { %p2160_p8 = pnand %p2159_p4, %p2153_p1 }
  0x26   : > { %2163 = shalt.err (!%p2160_p8)
}
  0x27   : > { %s2239_s12 = smov 256   ;;  %s2240_s13 = smov 16  }
  0x28   : > { %2033 = dma.hbm_to_vmem [thread:$0]  (!%p2329_p11), %s3145_s1, 4096, %s2322_s25, [#allocation3], %s2239_s12, %s2239_s12, %s2240_s13  }
  0x29   : > { %p68_p2 = scmp.eq.s32.totalorder %s67_s29, 0  ;;  %p77_p1 = scmp.ne.s32.totalorder %s2232_s17, %s2228_s16 }
  0x2a   : > { %p78_p4 = scmp.eq.s32.totalorder %s2236_s18, 0  ;;  %p2043_p6 = scmp.lt.s32.totalorder %s2236_s18, 2 }
  0x2b   : > { %s2365_s24 = scalar_select %p68_p2, %s2232_s17, %s70_s28  }
  0x2c   : > { %p79_p8 = por %p78_p4, %p77_p1  ;;  %p3156_p10 = scmp.eq.s32.totalorder %s2299_s19, 1 }
  0x2d   : > { %s175_s5 = sand.u32 1, %s2232_s17   ;;  %s2013_s6 = sshll.u32 %s2236_s18, 10 }
  0x2e   : > { %p2369_p12 = por %p3156_p10, %p77_p1  ;;  %s1878_s7 = sshll.u32 %s175_s5, 6 }
  0x2f   : > { %s2378_s9 = scalar_lea.hbm %s3146_s2, %s2013_s6  ;;  %s179_s25 = scalar_lea.vmem [#allocation5], %s1878_s7 }
  0x30   : > { %s186_s28 = sshll.u32 %s179_s25, 4  ;;  %p2380_p11 = pnand %p2043_p6, %p79_p8  ;;  %s2384_s28 = int_to_ptr.vmem [resolvable:$true] %s186_s28 }
  0x31   : > { %s2386_s10 = scalar_lea.sflag [#allocation6], %s175_s5  ;;  %s2164_s11 = scalar_lea.hbm %s2378_s9, 1024 }
  0x32   : > { %p2165_p13 = scmp.ne.s32.totalorder %s2378_s9, %s2164_s11  ;;  %p2166_p0 = pneg %p2380_p11 }
  0x33   : > { %s2169_s14 = scalar_lea.hbm %s3146_s2, 2048  ;;  %p2170_p7 = scmp.lt.u32.totalorder %s2378_s9, %s3146_s2 }
  0x34   : > { %p2167_p3 = pnand %p2166_p0, %p2165_p13  ;;  %p2171_p9 = scmp.lt.u32.totalorder %s2169_s14, %s2164_s11 }
  0x35   : > { %p2173_p1 = scmp.lt.u32.totalorder %s2164_s11, %s2378_s9 }
  0x36   : > { %p2168_p5 = pneg %p2167_p3  ;;  %p2172_p2 = por %p2171_p9, %p2170_p7 }
  0x38   : > { %p2174_p4 = por %p2173_p1, %p2172_p2 }
  0x3a   : > { %p2175_p6 = pnand %p2174_p4, %p2168_p5 }
  0x3c   : > { %2178 = shalt.err (!%p2175_p6)
}
  0x3d   : > { %s2179_s5 = scalar_lea.vmem %s2384_s28, 1024  ;;  %s2241_s7 = smov [#allocation5]  }
  0x3e   : > { %p2180_p8 = scmp.ne.s32.totalorder %s2384_s28, %s2179_s5  ;;  %s2184_s26 = sshll.u32 %s2241_s7, 4  ;;  %s2185_s26 = int_to_ptr.vmem [resolvable:$false] %s2184_s26 }
  0x3f   : > { %s2186_s8 = scalar_lea.vmem %s2185_s26, 2048  ;;  %p2187_p3 = scmp.lt.s32.totalorder %s2384_s28, %s2185_s26 }
  0x40   : > { %p2182_p10 = pnand %p2180_p8, %p2166_p0  ;;  %p2188_p7 = scmp.lt.s32.totalorder %s2186_s8, %s2179_s5 }
  0x42   : > { %p2183_p13 = pneg %p2182_p10  ;;  %p2189_p9 = por %p2188_p7, %p2187_p3 }
  0x44   : > { %p2190_p2 = pnand %p2189_p9, %p2183_p13 }
  0x46   : > { %2193 = shalt.err (!%p2190_p2)
}
  0x47   : > { %s2242_s25 = smov 64   ;;  %s2243_s11 = smov 4  }
  0x48   : > { %2037 = dma.hbm_to_vmem [thread:$0]  (!%p2380_p11), %s2378_s9, 1024, %s2384_s28, %s2386_s10, %s2242_s25, %s2242_s25, %s2243_s11  }
  0x49   : > { %p3159_p0 = scmp.ne.s32.totalorder %s3154_s23, 0 }
  0x4a   : > { %p3160_p5 = scmp.eq.s32.totalorder (!%p3159_p0), %s2299_s19, 0 }
  0x4b   : > { %207 = sbr.rel (%p3159_p0) target bundleno = 890 (0x37a), region = 36 }
  0x52   : > { %2211 = dma.done.wait (%p3160_p5), [#allocation3], 4096   ;;  %p3161_p1 = pmov %p3160_p5 }
  0x53   : > { %s2421_s12 = sand.u32 1, %s2228_s16   ;;  %p3162_p11 = scmp.ne.s32.totalorder %s3152_s21, 0 }
  0x54   : > { %2213 = vsyncadd (%p3161_p1), [#allocation3], 4294963200  ;;  %s1883_s13 = sshll.u32 %s2421_s12, 6  ;;  %s214_s14 = scalar_lea.sflag [#allocation6], %s2421_s12 }
  0x55   : > { %s2425_s20 = scalar_lea.vmem [#allocation5], %s1883_s13 }
  0x56   : > { %2215 = dma.done.wait (%p3162_p11), %s214_s14, 1024  }
  0x57   : > { %2217 = vsyncadd (%p3162_p11), %s214_s14, 4294966272  ;;  %v2244_v0 = vmov 0   ;;  %v273_v1 = vld [vmem:[%s3144_s0 + $0x8] sm:$0xff]  ;;  %v275_v2 = vld [vmem:[%s3144_s0 + $0x18] sm:$0xff]  ;;  %s1884_s10 = sshll.u32 %s2421_s12, 9  ;;  %s2245_s8 = smov 1  }
  0x58   : > { %400 = vmatprep.mubr.bf16.mxu0 %v2244_v0  ;;  %755 = vmatprep.mubr.bf16.mxu1 %v2244_v0  ;;  %v1896_v3 = vld [vmem:[%s3144_s0 + $0x88] sm:$0xff]  ;;  %v289_v4 = vpack.c.bf16 %v275_v2, %v273_v1  ;;  %v1898_v5 = vld [vmem:[%s3144_s0 + $0x98] sm:$0xff]  ;;  %v272_v6 = vld [vmem:[%s3144_s0] sm:$0xff]  ;;  %s2554_s21 = scalar_lea.vmem [#allocation7], %s1884_s10  ;;  %s1734_s25 = scalar_lea.sflag [#allocation4], %s2421_s12 }
  0x59   : > { %2093 = vset.pattern.permute.xlu1 %v2244_v0  ;;  %2092 = vset.pattern.permute.xlu0 %v2244_v0  ;;  %v274_v7 = vld [vmem:[%s3144_s0 + $0x10] sm:$0xff]  ;;  %v691_v8 = vpack.c.bf16 %v1898_v5, %v1896_v3  ;;  %v1895_v10 = vld [vmem:[%s3144_s0 + $0x80] sm:$0xff]  ;;  %v277_v12 = vld [vmem:[%s3144_s0 + $0x28] sm:$0xff] }
  0x5a   : > { %v288_v9 = vpack.c.bf16 %v274_v7, %v272_v6  ;;  %v1897_v11 = vld [vmem:[%s3144_s0 + $0x90] sm:$0xff]  ;;  %368 = vmatprep.subr.bf16.mxu0 %v289_v4  ;;  %v279_v14 = vld [vmem:[%s3144_s0 + $0x38] sm:$0xff]  ;;  %v1900_v15 = vld [vmem:[%s3144_s0 + $0xa8] sm:$0xff] }
  0x5b   : > { %v690_v13 = vpack.c.bf16 %v1897_v11, %v1895_v10  ;;  %v1902_v16 = vld [vmem:[%s3144_s0 + $0xb8] sm:$0xff]  ;;  %723 = vmatprep.subr.bf16.mxu1 %v691_v8  ;;  %v291_v17 = vpack.c.bf16 %v279_v14, %v277_v12  ;;  %v276_v19 = vld [vmem:[%s3144_s0 + $0x20] sm:$0xff]  ;;  %v278_v20 = vld [vmem:[%s3144_s0 + $0x30] sm:$0xff] }
  0x5c   : > { %369 = vmatpush1.bf16.msra.mxu0 %v288_v9  ;;  %v693_v18 = vpack.c.bf16 %v1902_v16, %v1900_v15  ;;  %v1899_v21 = vld [vmem:[%s3144_s0 + $0xa0] sm:$0xff]  ;;  %v290_v22 = vpack.c.bf16 %v278_v20, %v276_v19  ;;  %v1901_v23 = vld [vmem:[%s3144_s0 + $0xb0] sm:$0xff]  ;;  %v281_v24 = vld [vmem:[%s3144_s0 + $0x48] sm:$0xff] }
  0x5d   : > { %724 = vmatpush1.bf16.msra.mxu1 %v690_v13  ;;  %v283_v25 = vld [vmem:[%s3144_s0 + $0x58] sm:$0xff]  ;;  %370 = vmatprep.subr.bf16.mxu0 %v291_v17  ;;  %v692_v26 = vpack.c.bf16 %v1901_v23, %v1899_v21  ;;  %v1904_v28 = vld [vmem:[%s3144_s0 + $0xc8] sm:$0xff]  ;;  %v280_v30 = vld [vmem:[%s3144_s0 + $0x40] sm:$0xff] }
  0x5e   : > { %725 = vmatprep.subr.bf16.mxu1 %v693_v18  ;;  %v293_v27 = vpack.c.bf16 %v283_v25, %v281_v24  ;;  %v1906_v29 = vld [vmem:[%s3144_s0 + $0xd8] sm:$0xff]  ;;  %v282_v32 = vld [vmem:[%s3144_s0 + $0x50] sm:$0xff]  ;;  %v1903_v33 = vld [vmem:[%s3144_s0 + $0xc0] sm:$0xff] }
  0x5f   : > { %v695_v31 = vpack.c.bf16 %v1906_v29, %v1904_v28  ;;  %v1905_v34 = vld [vmem:[%s3144_s0 + $0xd0] sm:$0xff]  ;;  %v292_v35 = vpack.c.bf16 %v282_v32, %v280_v30  ;;  %v285_v36 = vld [vmem:[%s3144_s0 + $0x68] sm:$0xff]  ;;  %v287_v37 = vld [vmem:[%s3144_s0 + $0x78] sm:$0xff] }
  0x60   : > { %371 = vmatpush1.bf16.msra.mxu0 %v290_v22  ;;  %v1908_v38 = vld [vmem:[%s3144_s0 + $0xe8] sm:$0xff]  ;;  %v694_v39 = vpack.c.bf16 %v1905_v34, %v1903_v33  ;;  %v295_v40 = vpack.c.bf16 %v287_v37, %v285_v36  ;;  %v1910_v41 = vld [vmem:[%s3144_s0 + $0xf8] sm:$0xff]  ;;  %v284_v42 = vld [vmem:[%s3144_s0 + $0x60] sm:$0xff] }
  0x61   : > { %726 = vmatpush1.bf16.msra.mxu1 %v692_v26  ;;  %372 = vmatprep.subr.bf16.mxu0 %v293_v27  ;;  %v286_v43 = vld [vmem:[%s3144_s0 + $0x70] sm:$0xff]  ;;  %v697_v44 = vpack.c.bf16 %v1910_v41, %v1908_v38  ;;  %v1907_v45 = vld [vmem:[%s3144_s0 + $0xe0] sm:$0xff]  ;;  %v297_v47 = vld [vmem:[#allocation2 + $0x8] sm:$0xff] }
  0x62   : > { %727 = vmatprep.subr.bf16.mxu1 %v695_v31  ;;  %v1909_v46 = vld [vmem:[%s3144_s0 + $0xf0] sm:$0xff]  ;;  %v299_v48 = vld [vmem:[#allocation2 + $0x18] sm:$0xff]  ;;  %v700_v49 = vld [vmem:[#allocation2 + $0x88] sm:$0xff]  ;;  %v294_v51 = vpack.c.bf16 %v286_v43, %v284_v42 }
  0x63   : > { %v702_v50 = vld [vmem:[#allocation2 + $0x98] sm:$0xff]  ;;  %v696_v52 = vpack.c.bf16 %v1909_v46, %v1907_v45  ;;  %v313_v53 = vpack.c.bf16 %v299_v48, %v297_v47  ;;  %v296_v54 = vld [vmem:[#allocation2] sm:$0xff]  ;;  %v298_v55 = vld [vmem:[#allocation2 + $0x10] sm:$0xff] }
  0x64   : > { %373 = vmatpush1.bf16.msra.mxu0 %v292_v35  ;;  %v699_v56 = vld [vmem:[#allocation2 + $0x80] sm:$0xff]  ;;  %v716_v57 = vpack.c.bf16 %v702_v50, %v700_v49  ;;  %v701_v58 = vld [vmem:[#allocation2 + $0x90] sm:$0xff]  ;;  %v301_v59 = vld [vmem:[#allocation2 + $0x28] sm:$0xff]  ;;  %v312_v63 = vpack.c.bf16 %v298_v55, %v296_v54 }
  0x65   : > { %728 = vmatpush1.bf16.msra.mxu1 %v694_v39  ;;  %374 = vmatprep.subr.bf16.mxu0 %v295_v40  ;;  %v303_v60 = vld [vmem:[#allocation2 + $0x38] sm:$0xff]  ;;  %v704_v61 = vld [vmem:[#allocation2 + $0xa8] sm:$0xff]  ;;  %v300_v1 = vld [vmem:[#allocation2 + $0x20] sm:$0xff]  ;;  %v715_v2 = vpack.c.bf16 %v701_v58, %v699_v56 }
  0x66   : > { %729 = vmatprep.subr.bf16.mxu1 %v697_v44  ;;  %v706_v62 = vld [vmem:[#allocation2 + $0xb8] sm:$0xff]  ;;  %v315_v3 = vpack.c.bf16 %v303_v60, %v301_v59  ;;  %v302_v4 = vld [vmem:[#allocation2 + $0x30] sm:$0xff]  ;;  %v703_v5 = vld [vmem:[#allocation2 + $0xa0] sm:$0xff] }
  0x67   : > { %v705_v6 = vld [vmem:[#allocation2 + $0xb0] sm:$0xff]  ;;  %v718_v7 = vpack.c.bf16 %v706_v62, %v704_v61  ;;  %v305_v8 = vld [vmem:[#allocation2 + $0x48] sm:$0xff]  ;;  %v307_v9 = vld [vmem:[#allocation2 + $0x58] sm:$0xff]  ;;  %v314_v14 = vpack.c.bf16 %v302_v4, %v300_v1 }
  0x68   : > { %375 = vmatpush1.bf16.msra.mxu0 %v294_v51  ;;  %v708_v10 = vld [vmem:[#allocation2 + $0xc8] sm:$0xff]  ;;  %v710_v11 = vld [vmem:[#allocation2 + $0xd8] sm:$0xff]  ;;  %v304_v12 = vld [vmem:[#allocation2 + $0x40] sm:$0xff]  ;;  %v717_v19 = vpack.c.bf16 %v705_v6, %v703_v5  ;;  %v317_v20 = vpack.c.bf16 %v307_v9, %v305_v8 }
  0x69   : > { %730 = vmatpush1.bf16.msra.mxu1 %v696_v52  ;;  %376 = vmatprep.subr.bf16.mxu0 %v313_v53  ;;  %v306_v13 = vld [vmem:[#allocation2 + $0x50] sm:$0xff]  ;;  %v707_v15 = vld [vmem:[#allocation2 + $0xc0] sm:$0xff]  ;;  %v309_v17 = vld [vmem:[#allocation2 + $0x68] sm:$0xff]  ;;  %v720_v22 = vpack.c.bf16 %v710_v11, %v708_v10 }
  0x6a   : > { %731 = vmatprep.subr.bf16.mxu1 %v716_v57  ;;  %v709_v16 = vld [vmem:[#allocation2 + $0xd0] sm:$0xff]  ;;  %v311_v18 = vld [vmem:[#allocation2 + $0x78] sm:$0xff]  ;;  %v712_v21 = vld [vmem:[#allocation2 + $0xe8] sm:$0xff]  ;;  %v316_v25 = vpack.c.bf16 %v306_v13, %v304_v12 }
  0x6b   : > { %v714_v23 = vld [vmem:[#allocation2 + $0xf8] sm:$0xff]  ;;  %v308_v24 = vld [vmem:[#allocation2 + $0x60] sm:$0xff]  ;;  %v310_v26 = vld [vmem:[#allocation2 + $0x70] sm:$0xff]  ;;  %v719_v27 = vpack.c.bf16 %v709_v16, %v707_v15  ;;  %v319_v28 = vpack.c.bf16 %v311_v18, %v309_v17 }
  0x6c   : > { %377 = vmatpush1.bf16.msra.mxu0 %v312_v63  ;;  %v711_v29 = vld [vmem:[#allocation2 + $0xe0] sm:$0xff]  ;;  %v722_v30 = vpack.c.bf16 %v714_v23, %v712_v21  ;;  %v713_v31 = vld [vmem:[#allocation2 + $0xf0] sm:$0xff]  ;;  %v318_v32 = vpack.c.bf16 %v310_v26, %v308_v24  ;;  %v2097_v35 = vld [vmem:[%s2425_s20 + $0x8] sm:$0xff]  }
  0x6d   : > { %732 = vmatpush1.bf16.msra.mxu1 %v715_v2  ;;  %378 = vmatprep.subr.bf16.mxu0 %v315_v3  ;;  %v721_v33 = vpack.c.bf16 %v713_v31, %v711_v29  ;;  %v2096_v34 = vld [vmem:[%s2425_s20] sm:$0xff]   ;;  %v2098_v36 = vld [vmem:[%s2425_s20 + $0x10] sm:$0xff]   ;;  %v2099_v37 = vld [vmem:[%s2425_s20 + $0x18] sm:$0xff]  }
  0x6e   : > { %733 = vmatprep.subr.bf16.mxu1 %v718_v7  ;;  %v2100_v38 = vld [vmem:[%s2425_s20 + $0x20] sm:$0xff]   ;;  %v2101_v39 = vld [vmem:[%s2425_s20 + $0x28] sm:$0xff]   ;;  %v2102_v40 = vld [vmem:[%s2425_s20 + $0x30] sm:$0xff]  }
  0x6f   : > { %v2103_v41 = vld [vmem:[%s2425_s20 + $0x38] sm:$0xff]   ;;  %s1885_s20 = sshll.u32 %s2299_s19, 4 }
  0x70   : > { %379 = vmatpush1.bf16.msra.mxu0 %v314_v14  ;;  %p249_p4 = scmp.lt.s32.totalorder %s1885_s20, 31 }
  0x71   : > { %734 = vmatpush1.bf16.msra.mxu1 %v717_v19  ;;  %380 = vmatprep.subr.bf16.mxu0 %v317_v20 }
  0x72   : > { %735 = vmatprep.subr.bf16.mxu1 %v720_v22  ;;  %s3170_s20 = smov (!%p249_p4, %s1885_s20), 31 }
  0x73   : > { %s1886_s6 = sshll.u32 %s3170_s20, 3 }
  0x74   : > { %381 = vmatpush1.bf16.msra.mxu0 %v316_v25  ;;  %s2747_s26 = scalar_lea.vmem %s3147_s3, %s1886_s6 }
  0x75   : > { %736 = vmatpush1.bf16.msra.mxu1 %v719_v27  ;;  %382 = vmatprep.subr.bf16.mxu0 %v319_v28 }
  0x76   : > { %737 = vmatprep.subr.bf16.mxu1 %v722_v30 }
  0x78   : > { %383 = vmatpush1.bf16.msra.mxu0 %v318_v32 }
  0x79   : > { %738 = vmatpush1.bf16.msra.mxu1 %v721_v33 }
  0x7b   : > { %401 = vmatmul.mubr.bf16.vlgmr.msra.gmra.mrb[0].mxu0 %v2096_v34 }
  0x7c   : > { %756 = vmatmul.mubr.bf16.vlgmr.msra.gmra.mrb[0].mxu1 %v2096_v34  ;;  %410 = vmatprep.mubr.bf16.mxu0 %v2244_v0 }
  0x7d   : > { %765 = vmatprep.mubr.bf16.mxu1 %v2244_v0 }
  0x83   : > { %411 = vmatmul.mubr.bf16.gmra.mrb[4].mxu0 %v2097_v35 }
  0x84   : > { %766 = vmatmul.mubr.bf16.gmra.mrb[4].mxu1 %v2097_v35  ;;  %420 = vmatprep.mubr.bf16.mxu0 %v2244_v0 }
  0x85   : > { %775 = vmatprep.mubr.bf16.mxu1 %v2244_v0 }
  0x8b   : > { %421 = vmatmul.mubr.bf16.gmra.mrb[8].mxu0 %v2098_v36 }
  0x8c   : > { %776 = vmatmul.mubr.bf16.gmra.mrb[8].mxu1 %v2098_v36  ;;  %430 = vmatprep.mubr.bf16.mxu0 %v2244_v0 }
  0x8d   : > { %785 = vmatprep.mubr.bf16.mxu1 %v2244_v0 }
  0x93   : > { %431 = vmatmul.mubr.bf16.gmra.mrb[12].mxu0 %v2099_v37 }
  0x94   : > { %786 = vmatmul.mubr.bf16.gmra.mrb[12].mxu1 %v2099_v37  ;;  %440 = vmatprep.mubr.bf16.mxu0 %v2244_v0 }
  0x95   : > { %795 = vmatprep.mubr.bf16.mxu1 %v2244_v0 }
  0x9b   : > { %441 = vmatmul.mubr.bf16.gmra.mrb[16].mxu0 %v2100_v38 }
  0x9c   : > { %796 = vmatmul.mubr.bf16.gmra.mrb[16].mxu1 %v2100_v38  ;;  %450 = vmatprep.mubr.bf16.mxu0 %v2244_v0 }
  0x9d   : > { %805 = vmatprep.mubr.bf16.mxu1 %v2244_v0 }
  0xa3   : > { %451 = vmatmul.mubr.bf16.gmra.mrb[20].mxu0 %v2101_v39 }
  0xa4   : > { %806 = vmatmul.mubr.bf16.gmra.mrb[20].mxu1 %v2101_v39  ;;  %460 = vmatprep.mubr.bf16.mxu0 %v2244_v0 }
  0xa5   : > { %815 = vmatprep.mubr.bf16.mxu1 %v2244_v0 }
  0xab   : > { %461 = vmatmul.mubr.bf16.gmra.mrb[24].mxu0 %v2102_v40 }
  0xac   : > { %816 = vmatmul.mubr.bf16.gmra.mrb[24].mxu1 %v2102_v40  ;;  %470 = vmatprep.mubr.bf16.mxu0 %v2244_v0 }
  0xad   : > { %825 = vmatprep.mubr.bf16.mxu1 %v2244_v0 }
  0xb3   : > { %471 = vmatmul.mubr.bf16.gmra.mrb[28].mxu0 %v2103_v41 }
  0xb4   : > { %826 = vmatmul.mubr.bf16.gmra.mrb[28].mxu1 %v2103_v41 }
 0x14e   : > { %v402_v42 = vpop.f32.mrb[0].mxu0 }
 0x14f   : > { %481 = vst [vmem:[%s2554_s21] sm:$0xff] %v402_v42  ;;  %v757_v43 = vpop.f32.mrb[0].mxu1  ;;  %v404_v44 = vpop.f32.mrb[1].mxu0  ;;  %v577_v45 = vmul.f32 %v402_v42, %v402_v42 }
 0x150   : > { %1911 = vst [vmem:[%s2554_s21 + $0x100] sm:$0xff] %v757_v43  ;;  %482 = vst [vmem:[%s2554_s21 + $0x8] sm:$0xff] %v404_v44  ;;  %v759_v0 = vpop.f32.mrb[1].mxu1  ;;  %v406_v46 = vpop.f32.mrb[2].mxu0  ;;  %v513_v47 = vadd.f32 %v404_v44, %v402_v42  ;;  %v578_v48 = vmul.f32 %v404_v44, %v404_v44  ;;  %v933_v49 = vmul.f32 %v757_v43, %v757_v43 }
 0x151   : > { %1912 = vst [vmem:[%s2554_s21 + $0x108] sm:$0xff] %v759_v0  ;;  %483 = vst [vmem:[%s2554_s21 + $0x10] sm:$0xff] %v406_v46  ;;  %v761_v50 = vpop.f32.mrb[2].mxu1  ;;  %v408_v51 = vpop.f32.mrb[3].mxu0  ;;  %v869_v52 = vadd.f32 %v759_v0, %v757_v43  ;;  %v579_v53 = vmul.f32 %v406_v46, %v406_v46  ;;  %v934_v54 = vmul.f32 %v759_v0, %v759_v0 }
 0x152   : > { %1913 = vst [vmem:[%s2554_s21 + $0x110] sm:$0xff] %v761_v50  ;;  %484 = vst [vmem:[%s2554_s21 + $0x18] sm:$0xff] %v408_v51  ;;  %v763_v55 = vpop.f32.mrb[3].mxu1  ;;  %514 = vadd.xlane.f32.xlu0 %v513_v47  ;;  %v580_v56 = vmul.f32 %v408_v51, %v408_v51  ;;  %v516_v57 = vadd.f32 %v408_v51, %v406_v46  ;;  %v935_v58 = vmul.f32 %v761_v50, %v761_v50 }
 0x153   : > { %v609_v59 = vadd.f32 %v578_v48, %v577_v45  ;;  %1914 = vst [vmem:[%s2554_s21 + $0x118] sm:$0xff] %v763_v55  ;;  %v872_v60 = vadd.f32 %v763_v55, %v761_v50  ;;  %v936_v61 = vmul.f32 %v763_v55, %v763_v55  ;;  %v965_v62 = vadd.f32 %v934_v54, %v933_v49 }
 0x154   : > { %v612_v63 = vadd.f32 %v580_v56, %v579_v53 }
 0x155   : > { %873 = vadd.xlane.f32.xlu1 %v872_v60  ;;  %v968_v1 = vadd.f32 %v936_v61, %v935_v58 }
 0x156   : > { %870 = vadd.xlane.f32.xlu0 %v869_v52  ;;  %v412_v2 = vpop.f32.mrb[4].mxu0 }
 0x157   : > { %485 = vst [vmem:[%s2554_s21 + $0x20] sm:$0xff] %v412_v2  ;;  %v414_v3 = vpop.f32.mrb[5].mxu0  ;;  %v767_v4 = vpop.f32.mrb[4].mxu1  ;;  %v581_v5 = vmul.f32 %v412_v2, %v412_v2 }
 0x158   : > { %486 = vst [vmem:[%s2554_s21 + $0x28] sm:$0xff] %v414_v3  ;;  %v416_v6 = vpop.f32.mrb[6].mxu0  ;;  %1915 = vst [vmem:[%s2554_s21 + $0x120] sm:$0xff] %v767_v4  ;;  %v769_v7 = vpop.f32.mrb[5].mxu1  ;;  %v519_v8 = vadd.f32 %v414_v3, %v412_v2  ;;  %v582_v9 = vmul.f32 %v414_v3, %v414_v3  ;;  %v937_v10 = vmul.f32 %v767_v4, %v767_v4 }
 0x159   : > { %613 = vadd.xlane.f32.xlu1 %v612_v63  ;;  %487 = vst [vmem:[%s2554_s21 + $0x30] sm:$0xff] %v416_v6  ;;  %v418_v11 = vpop.f32.mrb[7].mxu0  ;;  %1916 = vst [vmem:[%s2554_s21 + $0x128] sm:$0xff] %v769_v7  ;;  %v771_v12 = vpop.f32.mrb[6].mxu1  ;;  %v875_v13 = vadd.f32 %v769_v7, %v767_v4  ;;  %v583_v14 = vmul.f32 %v416_v6, %v416_v6  ;;  %v938_v15 = vmul.f32 %v769_v7, %v769_v7 }
 0x15a   : > { %517 = vadd.xlane.f32.xlu0 %v516_v57  ;;  %488 = vst [vmem:[%s2554_s21 + $0x38] sm:$0xff] %v418_v11  ;;  %1917 = vst [vmem:[%s2554_s21 + $0x130] sm:$0xff] %v771_v12  ;;  %v773_v16 = vpop.f32.mrb[7].mxu1  ;;  %v522_v17 = vadd.f32 %v418_v11, %v416_v6  ;;  %v2571_v18 = vadd.f32 %v582_v9, %v581_v5  ;;  %v584_v19 = vmul.f32 %v418_v11, %v418_v11 }
 0x15b   : > { %v939_v20 = vmul.f32 %v771_v12, %v771_v12  ;;  %1918 = vst [vmem:[%s2554_s21 + $0x138] sm:$0xff] %v773_v16  ;;  %v878_v21 = vadd.f32 %v773_v16, %v771_v12  ;;  %v2574_v22 = vadd.f32 %v938_v15, %v937_v10  ;;  %v940_v23 = vmul.f32 %v773_v16, %v773_v16 }
 0x15c   : > { %v2576_v24 = vadd.f32 %v584_v19, %v583_v14 }
 0x15d   : > { %969 = vadd.xlane.f32.xlu1 %v968_v1  ;;  %v2578_v25 = vadd.f32 %v940_v23, %v939_v20 }
 0x15e   : > { %610 = vadd.xlane.f32.xlu0 %v609_v59  ;;  %v422_v26 = vpop.f32.mrb[8].mxu0 }
 0x15f   : > { %489 = vst [vmem:[%s2554_s21 + $0x40] sm:$0xff] %v422_v26  ;;  %v424_v27 = vpop.f32.mrb[9].mxu0  ;;  %v777_v28 = vpop.f32.mrb[8].mxu1  ;;  %v585_v29 = vmul.f32 %v422_v26, %v422_v26 }
 0x160   : > { %490 = vst [vmem:[%s2554_s21 + $0x48] sm:$0xff] %v424_v27  ;;  %v426_v30 = vpop.f32.mrb[10].mxu0  ;;  %1919 = vst [vmem:[%s2554_s21 + $0x140] sm:$0xff] %v777_v28  ;;  %v779_v31 = vpop.f32.mrb[9].mxu1  ;;  %v2583_v32 = vadd.f32 %v424_v27, %v422_v26  ;;  %v586_v33 = vmul.f32 %v424_v27, %v424_v27  ;;  %v941_v34 = vmul.f32 %v777_v28, %v777_v28 }
 0x161   : > { %520 = vadd.xlane.f32.xlu1 %v519_v8  ;;  %491 = vst [vmem:[%s2554_s21 + $0x50] sm:$0xff] %v426_v30  ;;  %v428_v35 = vpop.f32.mrb[11].mxu0  ;;  %1920 = vst [vmem:[%s2554_s21 + $0x148] sm:$0xff] %v779_v31  ;;  %v781_v36 = vpop.f32.mrb[10].mxu1  ;;  %v2587_v37 = vadd.f32 %v779_v31, %v777_v28  ;;  %v587_v38 = vmul.f32 %v426_v30, %v426_v30  ;;  %v942_v39 = vmul.f32 %v779_v31, %v779_v31 }
 0x162   : > { %966 = vadd.xlane.f32.xlu0 %v965_v62  ;;  %492 = vst [vmem:[%s2554_s21 + $0x58] sm:$0xff] %v428_v35  ;;  %1921 = vst [vmem:[%s2554_s21 + $0x150] sm:$0xff] %v781_v36  ;;  %v783_v40 = vpop.f32.mrb[11].mxu1  ;;  %v2591_v41 = vadd.f32 %v428_v35, %v426_v30  ;;  %v2593_v42 = vadd.f32 %v586_v33, %v585_v29  ;;  %v588_v43 = vmul.f32 %v428_v35, %v428_v35 }
 0x163   : > { %v943_v44 = vmul.f32 %v781_v36, %v781_v36  ;;  %1922 = vst [vmem:[%s2554_s21 + $0x158] sm:$0xff] %v783_v40  ;;  %v2596_v45 = vadd.f32 %v783_v40, %v781_v36  ;;  %v2598_v0 = vadd.f32 %v942_v39, %v941_v34  ;;  %v944_v46 = vmul.f32 %v783_v40, %v783_v40 }
 0x164   : > { %v2600_v47 = vadd.f32 %v588_v43, %v587_v38 }
 0x165   : > { %523 = vadd.xlane.f32.xlu1 %v522_v17  ;;  %v2602_v48 = vadd.f32 %v944_v46, %v943_v44 }
 0x166   : > { %876 = vadd.xlane.f32.xlu0 %v875_v13  ;;  %v432_v49 = vpop.f32.mrb[12].mxu0 }
 0x167   : > { %493 = vst [vmem:[%s2554_s21 + $0x60] sm:$0xff] %v432_v49  ;;  %v434_v50 = vpop.f32.mrb[13].mxu0  ;;  %v787_v51 = vpop.f32.mrb[12].mxu1  ;;  %v589_v52 = vmul.f32 %v432_v49, %v432_v49 }
 0x168   : > { %494 = vst [vmem:[%s2554_s21 + $0x68] sm:$0xff] %v434_v50  ;;  %v436_v53 = vpop.f32.mrb[14].mxu0  ;;  %1923 = vst [vmem:[%s2554_s21 + $0x160] sm:$0xff] %v787_v51  ;;  %v789_v54 = vpop.f32.mrb[13].mxu1  ;;  %v2607_v55 = vadd.f32 %v434_v50, %v432_v49  ;;  %v590_v56 = vmul.f32 %v434_v50, %v434_v50  ;;  %v945_v57 = vmul.f32 %v787_v51, %v787_v51 }
 0x169   : > { %879 = vadd.xlane.f32.xlu1 %v878_v21  ;;  %495 = vst [vmem:[%s2554_s21 + $0x70] sm:$0xff] %v436_v53  ;;  %v438_v58 = vpop.f32.mrb[15].mxu0  ;;  %1924 = vst [vmem:[%s2554_s21 + $0x168] sm:$0xff] %v789_v54  ;;  %v791_v59 = vpop.f32.mrb[14].mxu1  ;;  %v2611_v60 = vadd.f32 %v789_v54, %v787_v51  ;;  %v591_v61 = vmul.f32 %v436_v53, %v436_v53  ;;  %v946_v62 = vmul.f32 %v789_v54, %v789_v54 }
 0x16a   : > { %616 = vadd.xlane.f32.xlu0 %v2571_v18  ;;  %496 = vst [vmem:[%s2554_s21 + $0x78] sm:$0xff] %v438_v58  ;;  %1925 = vst [vmem:[%s2554_s21 + $0x170] sm:$0xff] %v791_v59  ;;  %v793_v63 = vpop.f32.mrb[15].mxu1  ;;  %v2616_v1 = vadd.f32 %v438_v58, %v436_v53  ;;  %v2618_v2 = vadd.f32 %v590_v56, %v589_v52  ;;  %v592_v3 = vmul.f32 %v438_v58, %v438_v58 }
 0x16b   : > { %v947_v4 = vmul.f32 %v791_v59, %v791_v59  ;;  %1926 = vst [vmem:[%s2554_s21 + $0x178] sm:$0xff] %v793_v63  ;;  %v2621_v5 = vadd.f32 %v793_v63, %v791_v59  ;;  %v2623_v6 = vadd.f32 %v946_v62, %v945_v57  ;;  %v948_v7 = vmul.f32 %v793_v63, %v793_v63 }
 0x16c   : > { %v2625_v8 = vadd.f32 %v592_v3, %v591_v61 }
 0x16d   : > { %619 = vadd.xlane.f32.xlu1 %v2576_v24  ;;  %v2628_v9 = vadd.f32 %v948_v7, %v947_v4 }
 0x16e   : > { %972 = vadd.xlane.f32.xlu0 %v2574_v22  ;;  %v442_v10 = vpop.f32.mrb[16].mxu0 }
 0x16f   : > { %497 = vst [vmem:[%s2554_s21 + $0x80] sm:$0xff] %v442_v10  ;;  %v444_v11 = vpop.f32.mrb[17].mxu0  ;;  %v797_v12 = vpop.f32.mrb[16].mxu1  ;;  %v593_v13 = vmul.f32 %v442_v10, %v442_v10 }
 0x170   : > { %498 = vst [vmem:[%s2554_s21 + $0x88] sm:$0xff] %v444_v11  ;;  %v446_v14 = vpop.f32.mrb[18].mxu0  ;;  %1927 = vst [vmem:[%s2554_s21 + $0x180] sm:$0xff] %v797_v12  ;;  %v799_v15 = vpop.f32.mrb[17].mxu1  ;;  %v2634_v16 = vadd.f32 %v444_v11, %v442_v10  ;;  %v594_v17 = vmul.f32 %v444_v11, %v444_v11  ;;  %v949_v18 = vmul.f32 %v797_v12, %v797_v12 }
 0x171   : > { %975 = vadd.xlane.f32.xlu1 %v2578_v25  ;;  %499 = vst [vmem:[%s2554_s21 + $0x90] sm:$0xff] %v446_v14  ;;  %v448_v19 = vpop.f32.mrb[19].mxu0  ;;  %1928 = vst [vmem:[%s2554_s21 + $0x188] sm:$0xff] %v799_v15  ;;  %v801_v20 = vpop.f32.mrb[18].mxu1  ;;  %v2639_v21 = vadd.f32 %v799_v15, %v797_v12  ;;  %v595_v22 = vmul.f32 %v446_v14, %v446_v14  ;;  %v950_v23 = vmul.f32 %v799_v15, %v799_v15 }
 0x172   : > { %526 = vadd.xlane.f32.xlu0 %v2583_v32  ;;  %500 = vst [vmem:[%s2554_s21 + $0x98] sm:$0xff] %v448_v19  ;;  %1929 = vst [vmem:[%s2554_s21 + $0x190] sm:$0xff] %v801_v20  ;;  %v803_v24 = vpop.f32.mrb[19].mxu1  ;;  %v2644_v26 = vadd.f32 %v448_v19, %v446_v14  ;;  %v2646_v27 = vadd.f32 %v594_v17, %v593_v13  ;;  %v596_v25 = vmul.f32 %v448_v19, %v448_v19 }
 0x173   : > { %v951_v28 = vmul.f32 %v801_v20, %v801_v20  ;;  %1930 = vst [vmem:[%s2554_s21 + $0x198] sm:$0xff] %v803_v24  ;;  %v2649_v29 = vadd.f32 %v803_v24, %v801_v20  ;;  %v2651_v30 = vadd.f32 %v950_v23, %v949_v18  ;;  %v952_v31 = vmul.f32 %v803_v24, %v803_v24 }
 0x174   : > { %v2653_v33 = vadd.f32 %v596_v25, %v595_v22 }
 0x175   : > { %529 = vadd.xlane.f32.xlu1 %v2591_v41  ;;  %v2656_v32 = vadd.f32 %v952_v31, %v951_v28 }
 0x176   : > { %882 = vadd.xlane.f32.xlu0 %v2587_v37  ;;  %v452_v34 = vpop.f32.mrb[20].mxu0 }
 0x177   : > { %501 = vst [vmem:[%s2554_s21 + $0xa0] sm:$0xff] %v452_v34  ;;  %v454_v35 = vpop.f32.mrb[21].mxu0  ;;  %v807_v36 = vpop.f32.mrb[20].mxu1  ;;  %v597_v38 = vmul.f32 %v452_v34, %v452_v34 }
 0x178   : > { %502 = vst [vmem:[%s2554_s21 + $0xa8] sm:$0xff] %v454_v35  ;;  %v456_v39 = vpop.f32.mrb[22].mxu0  ;;  %1931 = vst [vmem:[%s2554_s21 + $0x1a0] sm:$0xff] %v807_v36  ;;  %v809_v40 = vpop.f32.mrb[21].mxu1  ;;  %v2662_v43 = vadd.f32 %v454_v35, %v452_v34  ;;  %v598_v41 = vmul.f32 %v454_v35, %v454_v35  ;;  %v953_v44 = vmul.f32 %v807_v36, %v807_v36 }
 0x179   : > { %885 = vadd.xlane.f32.xlu1 %v2596_v45  ;;  %503 = vst [vmem:[%s2554_s21 + $0xb0] sm:$0xff] %v456_v39  ;;  %v458_v37 = vpop.f32.mrb[23].mxu0  ;;  %1932 = vst [vmem:[%s2554_s21 + $0x1a8] sm:$0xff] %v809_v40  ;;  %v811_v46 = vpop.f32.mrb[22].mxu1  ;;  %v2667_v49 = vadd.f32 %v809_v40, %v807_v36  ;;  %v599_v50 = vmul.f32 %v456_v39, %v456_v39  ;;  %v954_v51 = vmul.f32 %v809_v40, %v809_v40 }
 0x17a   : > { %622 = vadd.xlane.f32.xlu0 %v2593_v42  ;;  %504 = vst [vmem:[%s2554_s21 + $0xb8] sm:$0xff] %v458_v37  ;;  %1933 = vst [vmem:[%s2554_s21 + $0x1b0] sm:$0xff] %v811_v46  ;;  %v813_v52 = vpop.f32.mrb[23].mxu1  ;;  %v2672_v53 = vadd.f32 %v458_v37, %v456_v39  ;;  %v2674_v54 = vadd.f32 %v598_v41, %v597_v38  ;;  %v600_v45 = vmul.f32 %v458_v37, %v458_v37 }
 0x17b   : > { %v955_v56 = vmul.f32 %v811_v46, %v811_v46  ;;  %1934 = vst [vmem:[%s2554_s21 + $0x1b8] sm:$0xff] %v813_v52  ;;  %v2677_v57 = vadd.f32 %v813_v52, %v811_v46  ;;  %v2679_v58 = vadd.f32 %v954_v51, %v953_v44  ;;  %v956_v59 = vmul.f32 %v813_v52, %v813_v52 }
 0x17c   : > { %v2681_v61 = vadd.f32 %v600_v45, %v599_v50 }
 0x17d   : > { %625 = vadd.xlane.f32.xlu1 %v2600_v47  ;;  %v2684_v42 = vadd.f32 %v956_v59, %v955_v56 }
 0x17e   : > { %978 = vadd.xlane.f32.xlu0 %v2598_v0  ;;  %v462_v62 = vpop.f32.mrb[24].mxu0 }
 0x17f   : > { %505 = vst [vmem:[%s2554_s21 + $0xc0] sm:$0xff] %v462_v62  ;;  %v464_v63 = vpop.f32.mrb[25].mxu0  ;;  %v817_v3 = vpop.f32.mrb[24].mxu1  ;;  %v601_v4 = vmul.f32 %v462_v62, %v462_v62 }
 0x180   : > { %506 = vst [vmem:[%s2554_s21 + $0xc8] sm:$0xff] %v464_v63  ;;  %v466_v7 = vpop.f32.mrb[26].mxu0  ;;  %1935 = vst [vmem:[%s2554_s21 + $0x1c0] sm:$0xff] %v817_v3  ;;  %v819_v10 = vpop.f32.mrb[25].mxu1  ;;  %v2690_v11 = vadd.f32 %v464_v63, %v462_v62  ;;  %v602_v47 = vmul.f32 %v464_v63, %v464_v63  ;;  %v957_v12 = vmul.f32 %v817_v3, %v817_v3 }
 0x181   : > { %981 = vadd.xlane.f32.xlu1 %v2602_v48  ;;  %507 = vst [vmem:[%s2554_s21 + $0xd0] sm:$0xff] %v466_v7  ;;  %v468_v0 = vpop.f32.mrb[27].mxu0  ;;  %1936 = vst [vmem:[%s2554_s21 + $0x1c8] sm:$0xff] %v819_v10  ;;  %v821_v13 = vpop.f32.mrb[26].mxu1  ;;  %v2695_v14 = vadd.f32 %v819_v10, %v817_v3  ;;  %v603_v15 = vmul.f32 %v466_v7, %v466_v7  ;;  %v958_v17 = vmul.f32 %v819_v10, %v819_v10 }
 0x182   : > { %532 = vadd.xlane.f32.xlu0 %v2607_v55  ;;  %508 = vst [vmem:[%s2554_s21 + $0xd8] sm:$0xff] %v468_v0  ;;  %1937 = vst [vmem:[%s2554_s21 + $0x1d0] sm:$0xff] %v821_v13  ;;  %v823_v18 = vpop.f32.mrb[27].mxu1  ;;  %v2700_v19 = vadd.f32 %v468_v0, %v466_v7  ;;  %v2702_v20 = vadd.f32 %v602_v47, %v601_v4  ;;  %v604_v48 = vmul.f32 %v468_v0, %v468_v0 }
 0x183   : > { %v959_v22 = vmul.f32 %v821_v13, %v821_v13  ;;  %1938 = vst [vmem:[%s2554_s21 + $0x1d8] sm:$0xff] %v823_v18  ;;  %v908_v23 = vadd.f32 %v823_v18, %v821_v13  ;;  %v2705_v24 = vadd.f32 %v958_v17, %v957_v12  ;;  %v960_v25 = vmul.f32 %v823_v18, %v823_v18 }
 0x184   : > { %v648_v28 = vadd.f32 %v604_v48, %v603_v15 }
 0x185   : > { %535 = vadd.xlane.f32.xlu1 %v2616_v1  ;;  %v1004_v55 = vadd.f32 %v960_v25, %v959_v22 }
 0x186   : > { %888 = vadd.xlane.f32.xlu0 %v2611_v60  ;;  %v472_v31 = vpop.f32.mrb[28].mxu0 }
 0x187   : > { %509 = vst [vmem:[%s2554_s21 + $0xe0] sm:$0xff] %v472_v31  ;;  %v474_v34 = vpop.f32.mrb[29].mxu0  ;;  %v827_v35 = vpop.f32.mrb[28].mxu1  ;;  %v605_v36 = vmul.f32 %v472_v31, %v472_v31 }
 0x188   : > { %510 = vst [vmem:[%s2554_s21 + $0xe8] sm:$0xff] %v474_v34  ;;  %v476_v38 = vpop.f32.mrb[30].mxu0  ;;  %1939 = vst [vmem:[%s2554_s21 + $0x1e0] sm:$0xff] %v827_v35  ;;  %v829_v39 = vpop.f32.mrb[29].mxu1  ;;  %v555_v40 = vadd.f32 %v474_v34, %v472_v31  ;;  %v606_v41 = vmul.f32 %v474_v34, %v474_v34  ;;  %v961_v44 = vmul.f32 %v827_v35, %v827_v35 }
 0x189   : > { %891 = vadd.xlane.f32.xlu1 %v2621_v5  ;;  %511 = vst [vmem:[%s2554_s21 + $0xf0] sm:$0xff] %v476_v38  ;;  %v478_v60 = vpop.f32.mrb[31].mxu0  ;;  %1940 = vst [vmem:[%s2554_s21 + $0x1e8] sm:$0xff] %v829_v39  ;;  %v831_v1 = vpop.f32.mrb[30].mxu1  ;;  %v911_v37 = vadd.f32 %v829_v39, %v827_v35  ;;  %v607_v46 = vmul.f32 %v476_v38, %v476_v38  ;;  %v962_v50 = vmul.f32 %v829_v39, %v829_v39 }
 0x18a   : > { %628 = vadd.xlane.f32.xlu0 %v2618_v2  ;;  %512 = vst [vmem:[%s2554_s21 + $0xf8] sm:$0xff] %v478_v60  ;;  %v608_v51 = vmul.f32 %v478_v60, %v478_v60  ;;  %1941 = vst [vmem:[%s2554_s21 + $0x1f0] sm:$0xff] %v831_v1  ;;  %v833_v52 = vpop.f32.mrb[31].mxu1  ;;  %v558_v45 = vadd.f32 %v478_v60, %v476_v38  ;;  %v651_v56 = vadd.f32 %v606_v41, %v605_v36  ;;  %v2756_v36 = vld [vmem:[%s2747_s26] sm:$0xff] }
 0x18b   : > { %v963_v59 = vmul.f32 %v831_v1, %v831_v1  ;;  %1942 = vst [vmem:[%s2554_s21 + $0x1f8] sm:$0xff] %v833_v52  ;;  %v964_v62 = vmul.f32 %v833_v52, %v833_v52  ;;  %v914_v5 = vadd.f32 %v833_v52, %v831_v1  ;;  %v1007_v63 = vadd.f32 %v962_v50, %v961_v44 }
 0x18c   : > { %v654_v3 = vadd.f32 %v608_v51, %v607_v46 }
 0x18d   : > { %631 = vadd.xlane.f32.xlu1 %v2625_v8  ;;  %v1010_v4 = vadd.f32 %v964_v62, %v963_v59 }
 0x18e   : > { %984 = vadd.xlane.f32.xlu0 %v2623_v6 }
 0x191   : > { %987 = vadd.xlane.f32.xlu1 %v2628_v9 }
 0x192   : > { %538 = vadd.xlane.f32.xlu0 %v2634_v16 }
 0x195   : > { %541 = vadd.xlane.f32.xlu1 %v2644_v26 }
 0x196   : > { %894 = vadd.xlane.f32.xlu0 %v2639_v21 }
 0x199   : > { %897 = vadd.xlane.f32.xlu1 %v2649_v29 }
 0x19a   : > { %634 = vadd.xlane.f32.xlu0 %v2646_v27 }
 0x19d   : > { %637 = vadd.xlane.f32.xlu1 %v2653_v33 }
 0x19e   : > { %990 = vadd.xlane.f32.xlu0 %v2651_v30 }
 0x1a1   : > { %993 = vadd.xlane.f32.xlu1 %v2656_v32 }
 0x1a2   : > { %544 = vadd.xlane.f32.xlu0 %v2662_v43 }
 0x1a5   : > { %547 = vadd.xlane.f32.xlu1 %v2672_v53 }
 0x1a6   : > { %900 = vadd.xlane.f32.xlu0 %v2667_v49 }
 0x1a9   : > { %903 = vadd.xlane.f32.xlu1 %v2677_v57 }
 0x1aa   : > { %640 = vadd.xlane.f32.xlu0 %v2674_v54 }
 0x1ad   : > { %643 = vadd.xlane.f32.xlu1 %v2681_v61 }
 0x1ae   : > { %996 = vadd.xlane.f32.xlu0 %v2679_v58 }
 0x1b1   : > { %999 = vadd.xlane.f32.xlu1 %v2684_v42 }
 0x1b2   : > { %550 = vadd.xlane.f32.xlu0 %v2690_v11 }
 0x1b5   : > { %553 = vadd.xlane.f32.xlu1 %v2700_v19 }
 0x1b6   : > { %906 = vadd.xlane.f32.xlu0 %v2695_v14 }
 0x1b9   : > { %909 = vadd.xlane.f32.xlu1 %v908_v23 }
 0x1ba   : > { %646 = vadd.xlane.f32.xlu0 %v2702_v20  ;;  %v2750_v20 = vld [vmem:[%s2747_s26 + $0x8] sm:$0xff] }
 0x1bd   : > { %649 = vadd.xlane.f32.xlu1 %v648_v28 }
 0x1be   : > { %1002 = vadd.xlane.f32.xlu0 %v2705_v24 }
 0x1c1   : > { %1005 = vadd.xlane.f32.xlu1 %v1004_v55 }
 0x1c2   : > { %556 = vadd.xlane.f32.xlu0 %v555_v40 }
 0x1c5   : > { %559 = vadd.xlane.f32.xlu1 %v558_v45 }
 0x1c6   : > { %912 = vadd.xlane.f32.xlu0 %v911_v37 }
 0x1c9   : > { %915 = vadd.xlane.f32.xlu1 %v914_v5 }
 0x1ca   : > { %652 = vadd.xlane.f32.xlu0 %v651_v56 }
 0x1cd   : > { %655 = vadd.xlane.f32.xlu1 %v654_v3 }
 0x1ce   : > { %1008 = vadd.xlane.f32.xlu0 %v1007_v63 }
 0x1d1   : > { %1011 = vadd.xlane.f32.xlu1 %v1010_v4  ;;  %v2764_v4 = vld [vmem:[%s2747_s26 + $0x10] sm:$0xff] }
 0x1df   : > { %v515_v2 = vpop.xlane.xlu0 %514 }
 0x1e2   : > { %v874_v6 = vpop.xlane.xlu1 %873 }
 0x1e3   : > { %v871_v8 = vpop.xlane.xlu0 %870 }
 0x1e4   : > { %v917_v26 = vadd.f32 %v871_v8, %v515_v2 }
 0x1e6   : > { %v614_v9 = vpop.xlane.xlu1 %613  ;;  %v1029_v49 = vmul.f32 0.001953125, %v917_v26 }
 0x1e7   : > { %v518_v16 = vpop.xlane.xlu0 %517 }
 0x1e8   : > { %v918_v21 = vadd.f32 %v874_v6, %v518_v16  ;;  %v1061_v42 = vmul.f32 %v1029_v49, %v1029_v49 }
 0x1ea   : > { %v1030_v27 = vmul.f32 0.001953125, %v918_v21  ;;  %v970_v29 = vpop.xlane.xlu1 %969 }
 0x1eb   : > { %v1014_v30 = vadd.f32 %v970_v29, %v614_v9  ;;  %v611_v33 = vpop.xlane.xlu0 %610 }
 0x1ec   : > { %v1062_v32 = vmul.f32 %v1030_v27, %v1030_v27 }
 0x1ed   : > { %v1046_v43 = vmul.f32 0.001953125, %v1014_v30  ;;  %v2768_v30 = vld [vmem:[%s2747_s26 + $0x18] sm:$0xff] }
 0x1ee   : > { %v521_v53 = vpop.xlane.xlu1 %520 }
 0x1ef   : > { %v1078_v54 = vsub.f32 %v1046_v43, %v1062_v32  ;;  %v967_v57 = vpop.xlane.xlu0 %966 }
 0x1f0   : > { %v1013_v58 = vadd.f32 %v967_v57, %v611_v33 }
 0x1f1   : > { %v1110_v61 = vadd.f32 1e-05, %v1078_v54 }
 0x1f2   : > { %v1045_v7 = vmul.f32 0.001953125, %v1013_v58  ;;  %v524_v10 = vpop.xlane.xlu1 %523 }
 0x1f3   : > { %2104 = vrsqrt.f32 %v1110_v61  ;;  %v877_v11 = vpop.xlane.xlu0 %876 }
 0x1f4   : > { %v1077_v47 = vsub.f32 %v1045_v7, %v1061_v42  ;;  %v919_v0 = vadd.f32 %v877_v11, %v521_v53 }
 0x1f6   : > { %v1109_v12 = vadd.f32 1e-05, %v1077_v47  ;;  %v880_v13 = vpop.xlane.xlu1 %879  ;;  %v1031_v17 = vmul.f32 0.001953125, %v919_v0 }
 0x1f7   : > { %v617_v14 = vpop.xlane.xlu0 %616  ;;  %v920_v15 = vadd.f32 %v880_v13, %v524_v10 }
 0x1f8   : > { %2106 = vrsqrt.f32 %v1109_v12  ;;  %v1063_v24 = vmul.f32 %v1031_v17, %v1031_v17 }
 0x1f9   : > { %v2752_v23 = vmul.f32 0.001953125, %v920_v15 }
 0x1fa   : > { %v620_v18 = vpop.xlane.xlu1 %619 }
 0x1fb   : > { %v973_v19 = vpop.xlane.xlu0 %972  ;;  %v1064_v38 = vmul.f32 %v2752_v23, %v2752_v23 }
 0x1fc   : > { %v1015_v48 = vadd.f32 %v973_v19, %v617_v14 }
 0x1fd   : > { %v2105_v22 = vpop.eup %2104 }
 0x1fe   : > { %v1047_v25 = vmul.f32 0.001953125, %v1015_v48  ;;  %v976_v28 = vpop.xlane.xlu1 %975  ;;  %v1142_v55 = vmul.f32 %v2105_v22, %v2750_v20 }
 0x1ff   : > { %v1016_v31 = vadd.f32 %v976_v28, %v620_v18  ;;  %v527_v34 = vpop.xlane.xlu0 %526 }
 0x200   : > { %v1079_v35 = vsub.f32 %v1047_v25, %v1063_v24  ;;  %1292 = vperm.xlu1 %2093, %v1142_v55   ;;  %v1158_v60 = vmul.f32 %v1142_v55, %v1030_v27 }
 0x201   : > { %v1048_v39 = vmul.f32 0.001953125, %v1016_v31 }
 0x202   : > { %v2107_v40 = vpop.eup %2106  ;;  %v1111_v41 = vadd.f32 1e-05, %v1079_v35  ;;  %v530_v44 = vpop.xlane.xlu1 %529 }
 0x203   : > { %v1080_v1 = vsub.f32 %v1048_v39, %v1064_v38  ;;  %v883_v37 = vpop.xlane.xlu0 %882  ;;  %v1141_v46 = vmul.f32 %v2107_v40, %v2756_v36 }
 0x204   : > { %2108 = vrsqrt.f32 %v1111_v41  ;;  %1191 = vrot.lane.b32.xlu1 %v1158_v60, %s2245_s8  ;;  %v921_v51 = vadd.f32 %v883_v37, %v527_v34 }
 0x205   : > { %v1112_v50 = vadd.f32 1e-05, %v1080_v1  ;;  %1287 = vperm.xlu0 %2092, %v1141_v46   ;;  %v1157_v56 = vmul.f32 %v1141_v46, %v1029_v49 }
 0x206   : > { %v886_v52 = vpop.xlane.xlu1 %885  ;;  %v1033_v62 = vmul.f32 0.001953125, %v921_v51 }
 0x207   : > { %2110 = vrsqrt.f32 %v1112_v50  ;;  %v623_v45 = vpop.xlane.xlu0 %622  ;;  %v922_v59 = vadd.f32 %v886_v52, %v530_v44 }
 0x208   : > { %v1065_v8 = vmul.f32 %v1033_v62, %v1033_v62 }
 0x209   : > { %1189 = vrot.lane.b32.xlu0 %v1157_v56, %s2245_s8  ;;  %v1034_v2 = vmul.f32 0.001953125, %v922_v59 }
 0x20a   : > { %v626_v5 = vpop.xlane.xlu1 %625 }
 0x20b   : > { %v979_v63 = vpop.xlane.xlu0 %978  ;;  %v1066_v32 = vmul.f32 %v1034_v2, %v1034_v2 }
 0x20c   : > { %v1017_v3 = vadd.f32 %v979_v63, %v623_v45  ;;  %v2794_v63 = vld [vmem:[%s2747_s26 + $0x30] sm:$0xff] }
 0x20e   : > { %v2109_v6 = vpop.eup %2108  ;;  %v1049_v9 = vmul.f32 0.001953125, %v1017_v3  ;;  %v982_v16 = vpop.xlane.xlu1 %981 }
 0x20f   : > { %v1018_v21 = vadd.f32 %v982_v16, %v626_v5  ;;  %v533_v26 = vpop.xlane.xlu0 %532  ;;  %v1143_v27 = vmul.f32 %v2109_v6, %v2764_v4 }
 0x210   : > { %v1081_v29 = vsub.f32 %v1049_v9, %v1065_v8 }
 0x211   : > { %v2111_v33 = vpop.eup %2110  ;;  %v1050_v43 = vmul.f32 0.001953125, %v1018_v21  ;;  %1297 = vperm.xlu1 %2093, %v1143_v27   ;;  %v1159_v58 = vmul.f32 %v1143_v27, %v1031_v17  ;;  %v2778_v17 = vld [vmem:[%s2747_s26 + $0x20] sm:$0xff]  ;;  %v2800_v27 = vld [vmem:[%s2747_s26 + $0x38] sm:$0xff] }
 0x212   : > { %v1113_v49 = vadd.f32 1e-05, %v1081_v29  ;;  %v536_v53 = vpop.xlane.xlu1 %535  ;;  %v2771_v61 = vmul.f32 %v2111_v33, %v2768_v30 }
 0x213   : > { %v1082_v54 = vsub.f32 %v1050_v43, %v1066_v32  ;;  %v889_v57 = vpop.xlane.xlu0 %888 }
 0x214   : > { %2112 = vrsqrt.f32 %v1113_v49  ;;  %v923_v7 = vadd.f32 %v889_v57, %v533_v26  ;;  %v1160_v47 = vmul.f32 %v2771_v61, %v2752_v23  ;;  %v2784_v23 = vld [vmem:[%s2747_s26 + $0x28] sm:$0xff] }
 0x215   : > { %v1114_v42 = vadd.f32 1e-05, %v1082_v54  ;;  %1193 = vrot.lane.b32.xlu1 %v1159_v58, %s2245_s8 }
 0x216   : > { %v892_v10 = vpop.xlane.xlu1 %891  ;;  %v1035_v0 = vmul.f32 0.001953125, %v923_v7 }
 0x217   : > { %2114 = vrsqrt.f32 %v1114_v42  ;;  %v629_v11 = vpop.xlane.xlu0 %628  ;;  %v924_v12 = vadd.f32 %v892_v10, %v536_v53 }
 0x218   : > { %v1067_v48 = vmul.f32 %v1035_v0, %v1035_v0 }
 0x219   : > { %1195 = vrot.lane.b32.xlu1 %v1160_v47, %s2245_s8  ;;  %v1036_v18 = vmul.f32 0.001953125, %v924_v12 }
 0x21a   : > { %v632_v13 = vpop.xlane.xlu1 %631 }
 0x21b   : > { %v985_v14 = vpop.xlane.xlu0 %984  ;;  %v1068_v35 = vmul.f32 %v1036_v18, %v1036_v18 }
 0x21c   : > { %v1019_v15 = vadd.f32 %v985_v14, %v629_v11 }
 0x21e   : > { %v2113_v19 = vpop.eup %2112  ;;  %v1051_v22 = vmul.f32 0.001953125, %v1019_v15  ;;  %v988_v24 = vpop.xlane.xlu1 %987 }
 0x21f   : > { %v1020_v25 = vadd.f32 %v988_v24, %v632_v13  ;;  %v539_v28 = vpop.xlane.xlu0 %538  ;;  %v2781_v55 = vmul.f32 %v2113_v19, %v2778_v17 }
 0x220   : > { %v1083_v31 = vsub.f32 %v1051_v22, %v1067_v48  ;;  %v2810_v48 = vld [vmem:[%s2747_s26 + $0x40] sm:$0xff] }
 0x221   : > { %v2115_v34 = vpop.eup %2114  ;;  %v1052_v38 = vmul.f32 0.001953125, %v1020_v25  ;;  %v1161_v39 = vmul.f32 %v2781_v55, %v1033_v62 }
 0x222   : > { %v1115_v40 = vadd.f32 1e-05, %v1083_v31  ;;  %v542_v41 = vpop.xlane.xlu1 %541  ;;  %v2788_v44 = vmul.f32 %v2115_v34, %v2784_v23 }
 0x223   : > { %v1084_v60 = vsub.f32 %v1052_v38, %v1068_v35  ;;  %v895_v1 = vpop.xlane.xlu0 %894  ;;  %1197 = vrot.lane.b32.xlu0 %v1161_v39, %s2245_s8  ;;  %v2816_v38 = vld [vmem:[%s2747_s26 + $0x48] sm:$0xff] }
 0x224   : > { %2116 = vrsqrt.f32 %v1115_v40  ;;  %v1162_v37 = vmul.f32 %v2788_v44, %v1034_v2  ;;  %v925_v50 = vadd.f32 %v895_v1, %v539_v28 }
 0x225   : > { %v1116_v46 = vadd.f32 1e-05, %v1084_v60 }
 0x226   : > { %v898_v51 = vpop.xlane.xlu1 %897  ;;  %1199 = vrot.lane.b32.xlu1 %v1162_v37, %s2245_s8  ;;  %v1037_v56 = vmul.f32 0.001953125, %v925_v50 }
 0x227   : > { %2118 = vrsqrt.f32 %v1116_v46  ;;  %v635_v52 = vpop.xlane.xlu0 %634  ;;  %v926_v45 = vadd.f32 %v898_v51, %v542_v41 }
 0x228   : > { %v1069_v8 = vmul.f32 %v1037_v56, %v1037_v56 }
 0x229   : > { %v1038_v3 = vmul.f32 0.001953125, %v926_v45 }
 0x22a   : > { %v638_v59 = vpop.xlane.xlu1 %637 }
 0x22b   : > { %v991_v62 = vpop.xlane.xlu0 %990  ;;  %v1070_v32 = vmul.f32 %v1038_v3, %v1038_v3 }
 0x22c   : > { %v1021_v5 = vadd.f32 %v991_v62, %v635_v52 }
 0x22e   : > { %v2117_v6 = vpop.eup %2116  ;;  %v1053_v9 = vmul.f32 0.001953125, %v1021_v5  ;;  %v994_v2 = vpop.xlane.xlu1 %993 }
 0x22f   : > { %v1022_v16 = vadd.f32 %v994_v2, %v638_v59  ;;  %v545_v21 = vpop.xlane.xlu0 %544  ;;  %v2797_v26 = vmul.f32 %v2117_v6, %v2794_v63 }
 0x230   : > { %v1085_v29 = vsub.f32 %v1053_v9, %v1069_v8 }
 0x231   : > { %v2119_v33 = vpop.eup %2118  ;;  %v1054_v43 = vmul.f32 0.001953125, %v1022_v16  ;;  %v1163_v49 = vmul.f32 %v2797_v26, %v1035_v0 }
 0x232   : > { %v1117_v53 = vadd.f32 1e-05, %v1085_v29  ;;  %v548_v54 = vpop.xlane.xlu1 %547  ;;  %v2804_v57 = vmul.f32 %v2119_v33, %v2800_v27 }
 0x233   : > { %v1086_v58 = vsub.f32 %v1054_v43, %v1070_v32  ;;  %v901_v42 = vpop.xlane.xlu0 %900  ;;  %1201 = vrot.lane.b32.xlu0 %v1163_v49, %s2245_s8 }
 0x234   : > { %2120 = vrsqrt.f32 %v1117_v53  ;;  %v1164_v7 = vmul.f32 %v2804_v57, %v1036_v18  ;;  %v927_v11 = vadd.f32 %v901_v42, %v545_v21  ;;  %v2826_v21 = vld [vmem:[%s2747_s26 + $0x50] sm:$0xff] }
 0x235   : > { %v1118_v10 = vadd.f32 1e-05, %v1086_v58  ;;  %v2832_v58 = vld [vmem:[%s2747_s26 + $0x58] sm:$0xff] }
 0x236   : > { %v904_v47 = vpop.xlane.xlu1 %903  ;;  %1203 = vrot.lane.b32.xlu1 %v1164_v7, %s2245_s8  ;;  %v1039_v13 = vmul.f32 0.001953125, %v927_v11 }
 0x237   : > { %2122 = vrsqrt.f32 %v1118_v10  ;;  %v641_v12 = vpop.xlane.xlu0 %640  ;;  %v928_v0 = vadd.f32 %v904_v47, %v548_v54 }
 0x238   : > { %v1071_v25 = vmul.f32 %v1039_v13, %v1039_v13 }
 0x239   : > { %v1040_v22 = vmul.f32 0.001953125, %v928_v0 }
 0x23a   : > { %v644_v14 = vpop.xlane.xlu1 %643 }
 0x23b   : > { %v997_v15 = vpop.xlane.xlu0 %996  ;;  %v1072_v41 = vmul.f32 %v1040_v22, %v1040_v22 }
 0x23c   : > { %v1023_v19 = vadd.f32 %v997_v15, %v641_v12 }
 0x23e   : > { %v2121_v24 = vpop.eup %2120  ;;  %v1055_v28 = vmul.f32 0.001953125, %v1023_v19  ;;  %v1000_v18 = vpop.xlane.xlu1 %999 }
 0x23f   : > { %v1024_v31 = vadd.f32 %v1000_v18, %v644_v14  ;;  %v551_v34 = vpop.xlane.xlu0 %550  ;;  %v2813_v35 = vmul.f32 %v2121_v24, %v2810_v48 }
 0x240   : > { %v1087_v39 = vsub.f32 %v1055_v28, %v1071_v25 }
 0x241   : > { %v2123_v40 = vpop.eup %2122  ;;  %v1056_v60 = vmul.f32 0.001953125, %v1024_v31  ;;  %v1165_v1 = vmul.f32 %v2813_v35, %v1037_v56 }
 0x242   : > { %v1119_v37 = vadd.f32 1e-05, %v1087_v39  ;;  %v554_v46 = vpop.xlane.xlu1 %553  ;;  %v2820_v50 = vmul.f32 %v2123_v40, %v2816_v38 }
 0x243   : > { %v1088_v51 = vsub.f32 %v1056_v60, %v1072_v41  ;;  %v907_v52 = vpop.xlane.xlu0 %906  ;;  %1205 = vrot.lane.b32.xlu0 %v1165_v1, %s2245_s8  ;;  %v2839_v60 = vld [vmem:[%s2747_s26 + $0x60] sm:$0xff] }
 0x244   : > { %2124 = vrsqrt.f32 %v1119_v37  ;;  %v1166_v45 = vmul.f32 %v2820_v50, %v1038_v3  ;;  %v929_v62 = vadd.f32 %v907_v52, %v551_v34 }
 0x245   : > { %v1120_v59 = vadd.f32 1e-05, %v1088_v51 }
 0x246   : > { %v910_v5 = vpop.xlane.xlu1 %909  ;;  %1207 = vrot.lane.b32.xlu1 %v1166_v45, %s2245_s8  ;;  %v1041_v8 = vmul.f32 0.001953125, %v929_v62 }
 0x247   : > { %2126 = vrsqrt.f32 %v1120_v59  ;;  %v647_v56 = vpop.xlane.xlu0 %646  ;;  %v930_v6 = vadd.f32 %v910_v5, %v554_v46  ;;  %v2843_v59 = vld [vmem:[%s2747_s26 + $0x68] sm:$0xff] }
 0x248   : > { %v1073_v32 = vmul.f32 %v1041_v8, %v1041_v8 }
 0x249   : > { %v1042_v29 = vmul.f32 0.001953125, %v930_v6 }
 0x24a   : > { %v650_v9 = vpop.xlane.xlu1 %649 }
 0x24b   : > { %v1003_v2 = vpop.xlane.xlu0 %1002  ;;  %v1074_v10 = vmul.f32 %v1042_v29, %v1042_v29 }
 0x24c   : > { %v1025_v16 = vadd.f32 %v1003_v2, %v647_v56 }
 0x24e   : > { %v2125_v33 = vpop.eup %2124  ;;  %v1057_v43 = vmul.f32 0.001953125, %v1025_v16  ;;  %v1006_v3 = vpop.xlane.xlu1 %1005 }
 0x24f   : > { %v1026_v49 = vadd.f32 %v1006_v3, %v650_v9  ;;  %v557_v53 = vpop.xlane.xlu0 %556  ;;  %v2829_v54 = vmul.f32 %v2125_v33, %v2826_v21  ;;  %v2849_v3 = vld [vmem:[%s2747_s26 + $0x70] sm:$0xff] }
 0x250   : > { %v1089_v42 = vsub.f32 %v1057_v43, %v1073_v32 }
 0x251   : > { %v2127_v7 = vpop.eup %2126  ;;  %v1058_v11 = vmul.f32 0.001953125, %v1026_v49  ;;  %v1167_v47 = vmul.f32 %v2829_v54, %v1039_v13 }
 0x252   : > { %v1121_v12 = vadd.f32 1e-05, %v1089_v42  ;;  %v560_v0 = vpop.xlane.xlu1 %559  ;;  %v1152_v14 = vmul.f32 %v2127_v7, %v2832_v58  ;;  %v2853_v42 = vld [vmem:[%s2747_s26 + $0x78] sm:$0xff] }
 0x253   : > { %v1090_v15 = vsub.f32 %v1058_v11, %v1074_v10  ;;  %1209 = vrot.lane.b32.xlu0 %v1167_v47, %s2245_s8  ;;  %v913_v19 = vpop.xlane.xlu0 %912 }
 0x254   : > { %2128 = vrsqrt.f32 %v1121_v12  ;;  %v1168_v24 = vmul.f32 %v1152_v14, %v1040_v22  ;;  %v931_v28 = vadd.f32 %v913_v19, %v557_v53 }
 0x255   : > { %v1122_v25 = vadd.f32 1e-05, %v1090_v15 }
 0x256   : > { %1211 = vrot.lane.b32.xlu1 %v1168_v24, %s2245_s8  ;;  %v916_v18 = vpop.xlane.xlu1 %915  ;;  %v1043_v34 = vmul.f32 0.001953125, %v931_v28 }
 0x257   : > { %2130 = vrsqrt.f32 %v1122_v25  ;;  %v653_v31 = vpop.xlane.xlu0 %652  ;;  %v932_v13 = vadd.f32 %v916_v18, %v560_v0 }
 0x258   : > { %v1075_v46 = vmul.f32 %v1043_v34, %v1043_v34 }
 0x259   : > { %v1044_v1 = vmul.f32 0.001953125, %v932_v13 }
 0x25a   : > { %v656_v39 = vpop.xlane.xlu1 %655 }
 0x25b   : > { %v1009_v40 = vpop.xlane.xlu0 %1008  ;;  %v1076_v56 = vmul.f32 %v1044_v1, %v1044_v1 }
 0x25c   : > { %v1027_v41 = vadd.f32 %v1009_v40, %v653_v31 }
 0x25e   : > { %v2129_v37 = vpop.eup %2128  ;;  %v1059_v51 = vmul.f32 0.001953125, %v1027_v41  ;;  %v1012_v22 = vpop.xlane.xlu1 %1011 }
 0x25f   : > { %v1028_v52 = vadd.f32 %v1012_v22, %v656_v39  ;;  %v1153_v45 = vmul.f32 %v2129_v37, %v2839_v60 }
 0x260   : > { %v1091_v62 = vsub.f32 %v1059_v51, %v1075_v46 }
 0x261   : > { %v2131_v5 = vpop.eup %2130  ;;  %v1060_v6 = vmul.f32 0.001953125, %v1028_v52  ;;  %v1169_v9 = vmul.f32 %v1153_v45, %v1041_v8 }
 0x262   : > { %v1123_v2 = vadd.f32 1e-05, %v1091_v62  ;;  %v1154_v16 = vmul.f32 %v2131_v5, %v2843_v59  ;;  %v1255_v5 = vld [vmem:[%s2554_s21 + $0x10] sm:$0xff] }
 0x263   : > { %v1092_v33 = vsub.f32 %v1060_v6, %v1076_v56  ;;  %1213 = vrot.lane.b32.xlu0 %v1169_v9, %s2245_s8  ;;  %v1253_v56 = vld [vmem:[%s2554_s21] sm:$0xff]  ;;  %v1254_v6 = vld [vmem:[%s2554_s21 + $0x8] sm:$0xff] }
 0x264   : > { %2132 = vrsqrt.f32 %v1123_v2  ;;  %v1170_v32 = vmul.f32 %v1154_v16, %v1042_v29  ;;  %v1943_v9 = vld [vmem:[%s2554_s21 + $0x100] sm:$0xff]  ;;  %v1944_v2 = vld [vmem:[%s2554_s21 + $0x108] sm:$0xff] }
 0x265   : > { %v1124_v43 = vadd.f32 1e-05, %v1092_v33  ;;  %v1945_v33 = vld [vmem:[%s2554_s21 + $0x110] sm:$0xff] }
 0x266   : > { %1215 = vrot.lane.b32.xlu1 %v1170_v32, %s2245_s8  ;;  %v1946_v32 = vld [vmem:[%s2554_s21 + $0x118] sm:$0xff] }
 0x267   : > { %2134 = vrsqrt.f32 %v1124_v43 }
 0x26e   : > { %v2133_v49 = vpop.eup %2132 }
 0x26f   : > { %v1155_v53 = vmul.f32 %v2133_v49, %v2849_v3 }
 0x271   : > { %v2135_v8 = vpop.eup %2134  ;;  %v1171_v7 = vmul.f32 %v1155_v53, %v1043_v34 }
 0x272   : > { %v1156_v10 = vmul.f32 %v2135_v8, %v2853_v42  ;;  %v1257_v8 = vld [vmem:[%s2554_s21 + $0x20] sm:$0xff] }
 0x273   : > { %1217 = vrot.lane.b32.xlu0 %v1171_v7, %s2245_s8  ;;  %v1258_v7 = vld [vmem:[%s2554_s21 + $0x28] sm:$0xff] }
 0x274   : > { %v1172_v11 = vmul.f32 %v1156_v10, %v1044_v1 }
 0x276   : > { %1219 = vrot.lane.b32.xlu1 %v1172_v11, %s2245_s8 }
 0x277   : > { %1302 = vperm.xlu0 %2092, %v2771_v61  }
 0x27a   : > { %1307 = vperm.xlu1 %2093, %v2781_v55  }
 0x27b   : > { %1312 = vperm.xlu0 %2092, %v2788_v44  }
 0x27e   : > { %1317 = vperm.xlu1 %2093, %v2797_v26  }
 0x27f   : > { %1322 = vperm.xlu0 %2092, %v2804_v57   ;;  %v2865_v29 = vpop.permute.xlu1 %1292 }
 0x282   : > { %1327 = vperm.xlu1 %2093, %v2813_v35   ;;  %v2246_v35 = vmov 1  }
 0x283   : > { %1332 = vperm.xlu0 %2092, %v2820_v50   ;;  %v1192_v61 = vpop.permute.xlu1 %1191 }
 0x284   : > { %v2868_v47 = vpop.permute.xlu0 %1287  ;;  %v1238_v57 = vsub.f32 %v2750_v20, %v1192_v61 }
 0x285   : > { %v1365_v61 = vmul.f32 %v2868_v47, %v1253_v56 }
 0x286   : > { %1337 = vperm.xlu1 %2093, %v2829_v54  }
 0x287   : > { %1342 = vperm.xlu0 %2092, %v1152_v14  }
 0x288   : > { %v1190_v55 = vpop.permute.xlu0 %1189 }
 0x289   : > { %v1237_v26 = vsub.f32 %v2756_v36, %v1190_v55  ;;  %v1366_v55 = vmul.f32 %v2868_v47, %v1254_v6 }
 0x28a   : > { %1347 = vperm.xlu1 %2093, %v1153_v45  }
 0x28b   : > { %1352 = vperm.xlu0 %2092, %v1154_v16   ;;  %v1256_v16 = vld [vmem:[%s2554_s21 + $0x18] sm:$0xff] }
 0x28c   : > { %v1368_v49 = vmul.f32 %v2865_v29, %v1256_v16 }
 0x28e   : > { %1357 = vperm.xlu1 %2093, %v1155_v53   ;;  %v1607_v53 = vmul.f32 %v1945_v33, %v2865_v29 }
 0x28f   : > { %1362 = vperm.xlu0 %2092, %v1156_v10   ;;  %v1947_v10 = vld [vmem:[%s2554_s21 + $0x120] sm:$0xff] }
 0x290   : > { %v2870_v44 = vpop.permute.xlu1 %1297 }
 0x292   : > { %2094 = vset.pattern.permute.xlu1 %v2246_v35 }
 0x293   : > { %1399 = vperm.xlu1 %2094, %v1237_v26   ;;  %2095 = vset.pattern.permute.xlu0 %v2246_v35  ;;  %v1605_v26 = vmul.f32 %v1943_v9, %v2868_v47  ;;  %v1948_v35 = vld [vmem:[%s2554_s21 + $0x128] sm:$0xff] }
 0x294   : > { %1404 = vperm.xlu0 %2095, %v1238_v57   ;;  %v1194_v50 = vpop.permute.xlu1 %1193  ;;  %v1606_v57 = vmul.f32 %v1944_v2, %v2868_v47 }
 0x295   : > { %v1239_v54 = vsub.f32 %v2764_v4, %v1194_v50  ;;  %v1198_v12 = vpop.permute.xlu0 %1197  ;;  %v1260_v50 = vld [vmem:[%s2554_s21 + $0x38] sm:$0xff] }
 0x296   : > { %v1241_v0 = vsub.f32 %v2778_v17, %v1198_v12  ;;  %v1370_v12 = vmul.f32 %v2870_v44, %v1258_v7 }
 0x297   : > { %1409 = vperm.xlu1 %2094, %v1239_v54   ;;  %v1369_v54 = vmul.f32 %v2870_v44, %v1257_v8 }
 0x298   : > { %1419 = vperm.xlu0 %2095, %v1241_v0   ;;  %v1196_v14 = vpop.permute.xlu1 %1195  ;;  %v1609_v0 = vmul.f32 %v1947_v10, %v2870_v44 }
 0x299   : > { %v1240_v15 = vsub.f32 %v2768_v30, %v1196_v14  ;;  %v1610_v14 = vmul.f32 %v1948_v35, %v2870_v44  ;;  %v1263_v35 = vld [vmem:[%s2554_s21 + $0x50] sm:$0xff] }
 0x29b   : > { %1414 = vperm.xlu1 %2094, %v1240_v15   ;;  %v1949_v15 = vld [vmem:[%s2554_s21 + $0x130] sm:$0xff] }
 0x29c   : > { %v1200_v36 = vpop.permute.xlu1 %1199 }
 0x29d   : > { %v1242_v20 = vsub.f32 %v2784_v23, %v1200_v36  ;;  %v1950_v36 = vld [vmem:[%s2554_s21 + $0x138] sm:$0xff] }
 0x29f   : > { %1424 = vperm.xlu1 %2094, %v1242_v20   ;;  %v1261_v20 = vld [vmem:[%s2554_s21 + $0x40] sm:$0xff] }
 0x2a5   : > { %v1202_v19 = vpop.permute.xlu0 %1201 }
 0x2a6   : > { %v1243_v24 = vsub.f32 %v2794_v63, %v1202_v19 }
 0x2a8   : > { %v1204_v25 = vpop.permute.xlu1 %1203  ;;  %1429 = vperm.xlu0 %2095, %v1243_v24  }
 0x2a9   : > { %v1244_v4 = vsub.f32 %v2800_v27, %v1204_v25 }
 0x2ab   : > { %1434 = vperm.xlu1 %2094, %v1244_v4   ;;  %v1262_v4 = vld [vmem:[%s2554_s21 + $0x48] sm:$0xff] }
 0x2b5   : > { %v1206_v28 = vpop.permute.xlu0 %1205 }
 0x2b6   : > { %v1245_v17 = vsub.f32 %v2810_v48, %v1206_v28  ;;  %v1951_v28 = vld [vmem:[%s2554_s21 + $0x140] sm:$0xff] }
 0x2b8   : > { %v1208_v18 = vpop.permute.xlu1 %1207  ;;  %1439 = vperm.xlu0 %2095, %v1245_v17   ;;  %v1952_v17 = vld [vmem:[%s2554_s21 + $0x148] sm:$0xff] }
 0x2b9   : > { %v1246_v30 = vsub.f32 %v2816_v38, %v1208_v18 }
 0x2bb   : > { %1444 = vperm.xlu1 %2094, %v1246_v30  }
 0x2c5   : > { %v1210_v31 = vpop.permute.xlu0 %1209 }
 0x2c6   : > { %v1247_v23 = vsub.f32 %v2826_v21, %v1210_v31 }
 0x2c8   : > { %v1212_v13 = vpop.permute.xlu1 %1211  ;;  %1449 = vperm.xlu0 %2095, %v1247_v23  }
 0x2c9   : > { %v1248_v63 = vsub.f32 %v2832_v58, %v1212_v13 }
 0x2cb   : > { %1454 = vperm.xlu1 %2094, %v1248_v63  }
 0x2d5   : > { %v1214_v34 = vpop.permute.xlu0 %1213 }
 0x2d6   : > { %v1249_v27 = vsub.f32 %v2839_v60, %v1214_v34 }
 0x2d8   : > { %v1216_v39 = vpop.permute.xlu1 %1215  ;;  %1459 = vperm.xlu0 %2095, %v1249_v27  }
 0x2d9   : > { %v1250_v48 = vsub.f32 %v2843_v59, %v1216_v39 }
 0x2db   : > { %1464 = vperm.xlu1 %2094, %v1250_v48  }
 0x2e5   : > { %v1218_v40 = vpop.permute.xlu0 %1217 }
 0x2e6   : > { %v1251_v38 = vsub.f32 %v2849_v3, %v1218_v40  ;;  %v1367_v3 = vmul.f32 %v2865_v29, %v1255_v5 }
 0x2e8   : > { %v1220_v41 = vpop.permute.xlu1 %1219  ;;  %1469 = vperm.xlu0 %2095, %v1251_v38  }
 0x2e9   : > { %v1252_v21 = vsub.f32 %v2853_v42, %v1220_v41  ;;  %v1608_v42 = vmul.f32 %v1946_v32, %v2865_v29  ;;  %v1259_v29 = vld [vmem:[%s2554_s21 + $0x30] sm:$0xff] }
 0x2eb   : > { %1474 = vperm.xlu1 %2094, %v1252_v21  }
 0x2f6   : > { %v1303_v58 = vpop.permute.xlu0 %1302 }
 0x2f7   : > { %v2939_v19 = vmul.f32 %v1303_v58, %v1259_v29  ;;  %v2941_v24 = vmul.f32 %v1303_v58, %v1260_v50  ;;  %v2943_v47 = vmul.f32 %v1949_v15, %v1303_v58  ;;  %v2945_v25 = vmul.f32 %v1950_v36, %v1303_v58  ;;  %v1953_v15 = vld [vmem:[%s2554_s21 + $0x150] sm:$0xff]  ;;  %v1954_v36 = vld [vmem:[%s2554_s21 + $0x158] sm:$0xff] }
 0x2f9   : > { %v1308_v60 = vpop.permute.xlu1 %1307 }
 0x2fa   : > { %v2888_v1 = vpop.permute.xlu0 %1312  ;;  %v1373_v18 = vmul.f32 %v1308_v60, %v1261_v20  ;;  %v1374_v30 = vmul.f32 %v1308_v60, %v1262_v4  ;;  %v1613_v31 = vmul.f32 %v1951_v28, %v1308_v60  ;;  %v1614_v23 = vmul.f32 %v1952_v17, %v1308_v60 }
 0x2fd   : > { %v2890_v37 = vpop.permute.xlu1 %1317 }
 0x2fe   : > { %v2892_v46 = vpop.permute.xlu0 %1322 }
 0x301   : > { %v2894_v51 = vpop.permute.xlu1 %1327 }
 0x302   : > { %v2896_v22 = vpop.permute.xlu0 %1332 }
 0x305   : > { %v2898_v52 = vpop.permute.xlu1 %1337 }
 0x306   : > { %v2900_v45 = vpop.permute.xlu0 %1342 }
 0x309   : > { %v2902_v59 = vpop.permute.xlu1 %1347 }
 0x30a   : > { %v2904_v62 = vpop.permute.xlu0 %1352 }
 0x30d   : > { %v2914_v43 = vpop.permute.xlu1 %1357 }
 0x30e   : > { %v2923_v11 = vpop.permute.xlu0 %1362 }
 0x312   : > { %v1400_v13 = vpop.permute.xlu1 %1399 }
 0x313   : > { %v1477_v44 = vadd.f32 %v1400_v13, %v1365_v61  ;;  %v1478_v63 = vadd.f32 %v1400_v13, %v1366_v55  ;;  %v1637_v34 = vadd.f32 %v1605_v26, %v1400_v13  ;;  %v1638_v27 = vadd.f32 %v1606_v57, %v1400_v13  ;;  %v1405_v39 = vpop.permute.xlu0 %1404 }
 0x314   : > { %v1479_v48 = vadd.f32 %v1405_v39, %v1367_v3  ;;  %v1480_v40 = vadd.f32 %v1405_v39, %v1368_v49  ;;  %v1639_v38 = vadd.f32 %v1607_v53, %v1405_v39  ;;  %v1640_v41 = vadd.f32 %v1608_v42, %v1405_v39 }
 0x315   : > { %v1509_v21 = vmax.f32 %v1477_v44, 0.0  ;;  %v1510_v58 = vmax.f32 %v1478_v63, 0.0  ;;  %v1669_v5 = vmax.f32 %v1637_v34, 0.0  ;;  %v1670_v56 = vmax.f32 %v1638_v27, 0.0 }
 0x316   : > { %v1511_v60 = vmax.f32 %v1479_v48, 0.0  ;;  %v1512_v6 = vmax.f32 %v1480_v40, 0.0  ;;  %v1671_v9 = vmax.f32 %v1639_v38, 0.0  ;;  %v1672_v2 = vmax.f32 %v1640_v41, 0.0  ;;  %v1410_v16 = vpop.permute.xlu1 %1409  ;;  %v1265_v38 = vld [vmem:[%s2554_s21 + $0x60] sm:$0xff]  ;;  %v1266_v41 = vld [vmem:[%s2554_s21 + $0x68] sm:$0xff] }
 0x317   : > { %1541 = vst [vmem:[%s2554_s21] sm:$0xff] %v1509_v21  ;;  %1542 = vst [vmem:[%s2554_s21 + $0x8] sm:$0xff] %v1510_v58  ;;  %v1481_v33 = vadd.f32 %v1410_v16, %v1369_v54  ;;  %v1482_v32 = vadd.f32 %v1410_v16, %v1370_v12  ;;  %v1641_v3 = vadd.f32 %v1609_v0, %v1410_v16  ;;  %v1420_v53 = vpop.permute.xlu0 %1419  ;;  %v1955_v21 = vld [vmem:[%s2554_s21 + $0x160] sm:$0xff]  ;;  %v1956_v58 = vld [vmem:[%s2554_s21 + $0x168] sm:$0xff] }
 0x318   : > { %1975 = vst [vmem:[%s2554_s21 + $0x100] sm:$0xff] %v1669_v5  ;;  %1976 = vst [vmem:[%s2554_s21 + $0x108] sm:$0xff] %v1670_v56  ;;  %v1642_v49 = vadd.f32 %v1610_v14, %v1410_v16  ;;  %v1485_v42 = vadd.f32 %v1420_v53, %v1373_v18  ;;  %v1486_v8 = vadd.f32 %v1420_v53, %v1374_v30  ;;  %v1264_v14 = vld [vmem:[%s2554_s21 + $0x58] sm:$0xff] }
 0x319   : > { %1543 = vst [vmem:[%s2554_s21 + $0x10] sm:$0xff] %v1511_v60  ;;  %1544 = vst [vmem:[%s2554_s21 + $0x18] sm:$0xff] %v1512_v6  ;;  %v1645_v7 = vadd.f32 %v1613_v31, %v1420_v53  ;;  %v1646_v10 = vadd.f32 %v1614_v23, %v1420_v53  ;;  %v1513_v61 = vmax.f32 %v1481_v33, 0.0  ;;  %v1514_v55 = vmax.f32 %v1482_v32, 0.0  ;;  %v1268_v16 = vld [vmem:[%s2554_s21 + $0x78] sm:$0xff]  ;;  %v1957_v33 = vld [vmem:[%s2554_s21 + $0x170] sm:$0xff] }
 0x31a   : > { %1977 = vst [vmem:[%s2554_s21 + $0x110] sm:$0xff] %v1671_v9  ;;  %1978 = vst [vmem:[%s2554_s21 + $0x118] sm:$0xff] %v1672_v2  ;;  %v1673_v26 = vmax.f32 %v1641_v3, 0.0  ;;  %v1674_v57 = vmax.f32 %v1642_v49, 0.0  ;;  %v1517_v29 = vmax.f32 %v1485_v42, 0.0  ;;  %v1518_v50 = vmax.f32 %v1486_v8, 0.0  ;;  %v1415_v0 = vpop.permute.xlu1 %1414 }
 0x31b   : > { %v1677_v54 = vmax.f32 %v1645_v7, 0.0  ;;  %v1678_v12 = vmax.f32 %v1646_v10, 0.0  ;;  %1545 = vst [vmem:[%s2554_s21 + $0x20] sm:$0xff] %v1513_v61  ;;  %1546 = vst [vmem:[%s2554_s21 + $0x28] sm:$0xff] %v1514_v55  ;;  %v1483_v20 = vadd.f32 %v1415_v0, %v2939_v19  ;;  %v1484_v4 = vadd.f32 %v1415_v0, %v2941_v24  ;;  %v1267_v9 = vld [vmem:[%s2554_s21 + $0x70] sm:$0xff]  ;;  %v1958_v32 = vld [vmem:[%s2554_s21 + $0x178] sm:$0xff] }
 0x31c   : > { %1979 = vst [vmem:[%s2554_s21 + $0x120] sm:$0xff] %v1673_v26  ;;  %1980 = vst [vmem:[%s2554_s21 + $0x128] sm:$0xff] %v1674_v57  ;;  %v1643_v28 = vadd.f32 %v2943_v47, %v1415_v0  ;;  %v1644_v17 = vadd.f32 %v2945_v25, %v1415_v0  ;;  %v1375_v18 = vmul.f32 %v2888_v1, %v1263_v35 }
 0x31d   : > { %v1376_v30 = vmul.f32 %v2888_v1, %v1264_v14  ;;  %v1615_v31 = vmul.f32 %v1953_v15, %v2888_v1  ;;  %v1616_v23 = vmul.f32 %v1954_v36, %v2888_v1  ;;  %1549 = vst [vmem:[%s2554_s21 + $0x40] sm:$0xff] %v1517_v29  ;;  %1550 = vst [vmem:[%s2554_s21 + $0x48] sm:$0xff] %v1518_v50  ;;  %v1515_v19 = vmax.f32 %v1483_v20, 0.0  ;;  %v1269_v36 = vld [vmem:[%s2554_s21 + $0x80] sm:$0xff]  ;;  %v1270_v20 = vld [vmem:[%s2554_s21 + $0x88] sm:$0xff] }
 0x31e   : > { %1983 = vst [vmem:[%s2554_s21 + $0x140] sm:$0xff] %v1677_v54  ;;  %1984 = vst [vmem:[%s2554_s21 + $0x148] sm:$0xff] %v1678_v12  ;;  %v1516_v24 = vmax.f32 %v1484_v4, 0.0  ;;  %v1675_v47 = vmax.f32 %v1643_v28, 0.0  ;;  %v1676_v25 = vmax.f32 %v1644_v17, 0.0  ;;  %v1425_v13 = vpop.permute.xlu1 %1424  ;;  %v1377_v5 = vmul.f32 %v2890_v37, %v1265_v38  ;;  %v1959_v4 = vld [vmem:[%s2554_s21 + $0x180] sm:$0xff] }
 0x31f   : > { %1547 = vst [vmem:[%s2554_s21 + $0x30] sm:$0xff] %v1515_v19  ;;  %v1487_v1 = vadd.f32 %v1425_v13, %v1375_v18  ;;  %v1488_v44 = vadd.f32 %v1425_v13, %v1376_v30  ;;  %v1647_v63 = vadd.f32 %v1615_v31, %v1425_v13  ;;  %v1648_v34 = vadd.f32 %v1616_v23, %v1425_v13  ;;  %v1960_v28 = vld [vmem:[%s2554_s21 + $0x188] sm:$0xff]  ;;  %v1271_v23 = vld [vmem:[%s2554_s21 + $0x90] sm:$0xff] }
 0x320   : > { %1548 = vst [vmem:[%s2554_s21 + $0x38] sm:$0xff] %v1516_v24  ;;  %1981 = vst [vmem:[%s2554_s21 + $0x130] sm:$0xff] %v1675_v47  ;;  %v1378_v56 = vmul.f32 %v2890_v37, %v1266_v41  ;;  %v1617_v60 = vmul.f32 %v1955_v21, %v2890_v37  ;;  %v1618_v6 = vmul.f32 %v1956_v58, %v2890_v37  ;;  %v1272_v24 = vld [vmem:[%s2554_s21 + $0x98] sm:$0xff]  ;;  %v1961_v47 = vld [vmem:[%s2554_s21 + $0x190] sm:$0xff] }
 0x321   : > { %1982 = vst [vmem:[%s2554_s21 + $0x138] sm:$0xff] %v1676_v25  ;;  %v1519_v27 = vmax.f32 %v1487_v1, 0.0  ;;  %v1520_v39 = vmax.f32 %v1488_v44, 0.0  ;;  %v1679_v48 = vmax.f32 %v1647_v63, 0.0  ;;  %v1680_v40 = vmax.f32 %v1648_v34, 0.0  ;;  %v1962_v25 = vld [vmem:[%s2554_s21 + $0x198] sm:$0xff] }
 0x322   : > { %v1379_v8 = vmul.f32 %v2892_v46, %v1267_v9  ;;  %v1380_v7 = vmul.f32 %v2892_v46, %v1268_v16  ;;  %v1619_v10 = vmul.f32 %v1957_v33, %v2892_v46  ;;  %v1620_v37 = vmul.f32 %v1958_v32, %v2892_v46  ;;  %v1273_v16 = vld [vmem:[%s2554_s21 + $0xa0] sm:$0xff]  ;;  %v1274_v33 = vld [vmem:[%s2554_s21 + $0xa8] sm:$0xff] }
 0x323   : > { %1551 = vst [vmem:[%s2554_s21 + $0x50] sm:$0xff] %v1519_v27  ;;  %1552 = vst [vmem:[%s2554_s21 + $0x58] sm:$0xff] %v1520_v39  ;;  %v1381_v17 = vmul.f32 %v2894_v51, %v1269_v36  ;;  %v1382_v18 = vmul.f32 %v2894_v51, %v1270_v20  ;;  %v1621_v30 = vmul.f32 %v1959_v4, %v2894_v51  ;;  %v1963_v32 = vld [vmem:[%s2554_s21 + $0x1a0] sm:$0xff] }
 0x324   : > { %1985 = vst [vmem:[%s2554_s21 + $0x150] sm:$0xff] %v1679_v48  ;;  %1986 = vst [vmem:[%s2554_s21 + $0x158] sm:$0xff] %v1680_v40  ;;  %v1622_v31 = vmul.f32 %v1960_v28, %v2894_v51  ;;  %v1383_v34 = vmul.f32 %v2896_v22, %v1271_v23  ;;  %v1384_v27 = vmul.f32 %v2896_v22, %v1272_v24  ;;  %v1277_v23 = vld [vmem:[%s2554_s21 + $0xc0] sm:$0xff] }
 0x325   : > { %v1623_v39 = vmul.f32 %v1961_v47, %v2896_v22  ;;  %v1624_v51 = vmul.f32 %v1962_v25, %v2896_v22  ;;  %v1967_v24 = vld [vmem:[%s2554_s21 + $0x1c0] sm:$0xff]  ;;  %v1968_v47 = vld [vmem:[%s2554_s21 + $0x1c8] sm:$0xff]  ;;  %v1389_v25 = vmul.f32 %v2902_v59, %v1277_v23 }
 0x327   : > { %v1430_v2 = vpop.permute.xlu0 %1429 }
 0x328   : > { %v1489_v3 = vadd.f32 %v1430_v2, %v1377_v5  ;;  %v1490_v49 = vadd.f32 %v1430_v2, %v1378_v56  ;;  %v1649_v53 = vadd.f32 %v1617_v60, %v1430_v2  ;;  %v1650_v42 = vadd.f32 %v1618_v6, %v1430_v2 }
 0x32a   : > { %v1521_v61 = vmax.f32 %v1489_v3, 0.0  ;;  %v1522_v55 = vmax.f32 %v1490_v49, 0.0  ;;  %v1681_v26 = vmax.f32 %v1649_v53, 0.0  ;;  %v1682_v57 = vmax.f32 %v1650_v42, 0.0  ;;  %v1435_v35 = vpop.permute.xlu1 %1434  ;;  %v1964_v3 = vld [vmem:[%s2554_s21 + $0x1a8] sm:$0xff] }
 0x32b   : > { %v1491_v29 = vadd.f32 %v1435_v35, %v1379_v8  ;;  %v1492_v50 = vadd.f32 %v1435_v35, %v1380_v7  ;;  %v1651_v54 = vadd.f32 %v1619_v10, %v1435_v35  ;;  %v1652_v12 = vadd.f32 %v1620_v37, %v1435_v35  ;;  %v1275_v7 = vld [vmem:[%s2554_s21 + $0xb0] sm:$0xff]  ;;  %v1276_v37 = vld [vmem:[%s2554_s21 + $0xb8] sm:$0xff] }
 0x32c   : > { %1553 = vst [vmem:[%s2554_s21 + $0x60] sm:$0xff] %v1521_v61  ;;  %1554 = vst [vmem:[%s2554_s21 + $0x68] sm:$0xff] %v1522_v55  ;;  %v1385_v49 = vmul.f32 %v2898_v52, %v1273_v16  ;;  %v1386_v53 = vmul.f32 %v2898_v52, %v1274_v33  ;;  %v1625_v42 = vmul.f32 %v1963_v32, %v2898_v52  ;;  %v1965_v61 = vld [vmem:[%s2554_s21 + $0x1b0] sm:$0xff]  ;;  %v1966_v55 = vld [vmem:[%s2554_s21 + $0x1b8] sm:$0xff] }
 0x32d   : > { %1987 = vst [vmem:[%s2554_s21 + $0x160] sm:$0xff] %v1681_v26  ;;  %1988 = vst [vmem:[%s2554_s21 + $0x168] sm:$0xff] %v1682_v57  ;;  %v1523_v46 = vmax.f32 %v1491_v29, 0.0  ;;  %v1524_v0 = vmax.f32 %v1492_v50, 0.0  ;;  %v1683_v14 = vmax.f32 %v1651_v54, 0.0  ;;  %v1684_v15 = vmax.f32 %v1652_v12, 0.0 }
 0x32e   : > { %v1626_v8 = vmul.f32 %v1964_v3, %v2898_v52  ;;  %v1387_v50 = vmul.f32 %v2900_v45, %v1275_v7  ;;  %v1388_v54 = vmul.f32 %v2900_v45, %v1276_v37  ;;  %v1627_v12 = vmul.f32 %v1965_v61, %v2900_v45  ;;  %v1971_v7 = vld [vmem:[%s2554_s21 + $0x1e0] sm:$0xff] }
 0x32f   : > { %1555 = vst [vmem:[%s2554_s21 + $0x70] sm:$0xff] %v1523_v46  ;;  %1556 = vst [vmem:[%s2554_s21 + $0x78] sm:$0xff] %v1524_v0  ;;  %v1628_v52 = vmul.f32 %v1966_v55, %v2900_v45  ;;  %v1633_v55 = vmul.f32 %v1971_v7, %v2914_v43 }
 0x330   : > { %1989 = vst [vmem:[%s2554_s21 + $0x170] sm:$0xff] %v1683_v14  ;;  %1990 = vst [vmem:[%s2554_s21 + $0x178] sm:$0xff] %v1684_v15 }
 0x337   : > { %v1440_v19 = vpop.permute.xlu0 %1439 }
 0x338   : > { %v1493_v13 = vadd.f32 %v1440_v19, %v1381_v17  ;;  %v1494_v1 = vadd.f32 %v1440_v19, %v1382_v18  ;;  %v1653_v44 = vadd.f32 %v1621_v30, %v1440_v19  ;;  %v1654_v63 = vadd.f32 %v1622_v31, %v1440_v19  ;;  %v1278_v19 = vld [vmem:[%s2554_s21 + $0xc8] sm:$0xff] }
 0x33a   : > { %v1525_v48 = vmax.f32 %v1493_v13, 0.0  ;;  %v1526_v40 = vmax.f32 %v1494_v1, 0.0  ;;  %v1685_v38 = vmax.f32 %v1653_v44, 0.0  ;;  %v1686_v41 = vmax.f32 %v1654_v63, 0.0  ;;  %v1445_v21 = vpop.permute.xlu1 %1444  ;;  %v1279_v63 = vld [vmem:[%s2554_s21 + $0xd0] sm:$0xff] }
 0x33b   : > { %v1495_v58 = vadd.f32 %v1445_v21, %v1383_v34  ;;  %v1496_v5 = vadd.f32 %v1445_v21, %v1384_v27  ;;  %v1655_v56 = vadd.f32 %v1623_v39, %v1445_v21  ;;  %v1656_v60 = vadd.f32 %v1624_v51, %v1445_v21  ;;  %v1280_v27 = vld [vmem:[%s2554_s21 + $0xd8] sm:$0xff]  ;;  %v1969_v39 = vld [vmem:[%s2554_s21 + $0x1d0] sm:$0xff] }
 0x33c   : > { %1557 = vst [vmem:[%s2554_s21 + $0x80] sm:$0xff] %v1525_v48  ;;  %1558 = vst [vmem:[%s2554_s21 + $0x88] sm:$0xff] %v1526_v40  ;;  %v1390_v13 = vmul.f32 %v2902_v59, %v1278_v19  ;;  %v1629_v1 = vmul.f32 %v1967_v24, %v2902_v59  ;;  %v1630_v44 = vmul.f32 %v1968_v47, %v2902_v59  ;;  %v1970_v51 = vld [vmem:[%s2554_s21 + $0x1d8] sm:$0xff] }
 0x33d   : > { %1991 = vst [vmem:[%s2554_s21 + $0x180] sm:$0xff] %v1685_v38  ;;  %1992 = vst [vmem:[%s2554_s21 + $0x188] sm:$0xff] %v1686_v41  ;;  %v1527_v22 = vmax.f32 %v1495_v58, 0.0  ;;  %v1528_v6 = vmax.f32 %v1496_v5, 0.0  ;;  %v1687_v9 = vmax.f32 %v1655_v56, 0.0  ;;  %v1688_v2 = vmax.f32 %v1656_v60, 0.0 }
 0x33e   : > { %v1391_v21 = vmul.f32 %v2904_v62, %v1279_v63  ;;  %v1392_v58 = vmul.f32 %v2904_v62, %v1280_v27  ;;  %v1631_v5 = vmul.f32 %v1969_v39, %v2904_v62  ;;  %v1632_v59 = vmul.f32 %v1970_v51, %v2904_v62 }
 0x33f   : > { %1559 = vst [vmem:[%s2554_s21 + $0x90] sm:$0xff] %v1527_v22  ;;  %1560 = vst [vmem:[%s2554_s21 + $0x98] sm:$0xff] %v1528_v6 }
 0x340   : > { %1993 = vst [vmem:[%s2554_s21 + $0x190] sm:$0xff] %v1687_v9  ;;  %1994 = vst [vmem:[%s2554_s21 + $0x198] sm:$0xff] %v1688_v2 }
 0x347   : > { %v1450_v10 = vpop.permute.xlu0 %1449 }
 0x348   : > { %v1497_v26 = vadd.f32 %v1450_v10, %v1385_v49  ;;  %v1498_v57 = vadd.f32 %v1450_v10, %v1386_v53  ;;  %v1657_v35 = vadd.f32 %v1625_v42, %v1450_v10  ;;  %v1658_v29 = vadd.f32 %v1626_v8, %v1450_v10  ;;  %v1281_v42 = vld [vmem:[%s2554_s21 + $0xe0] sm:$0xff]  ;;  %v1282_v8 = vld [vmem:[%s2554_s21 + $0xe8] sm:$0xff] }
 0x349   : > { %v1972_v10 = vld [vmem:[%s2554_s21 + $0x1e8] sm:$0xff]  ;;  %v1393_v37 = vmul.f32 %v2914_v43, %v1281_v42  ;;  %v1394_v61 = vmul.f32 %v2914_v43, %v1282_v8 }
 0x34a   : > { %v1529_v46 = vmax.f32 %v1497_v26, 0.0  ;;  %v1530_v0 = vmax.f32 %v1498_v57, 0.0  ;;  %v1689_v14 = vmax.f32 %v1657_v35, 0.0  ;;  %v1690_v15 = vmax.f32 %v1658_v29, 0.0  ;;  %v1455_v36 = vpop.permute.xlu1 %1454  ;;  %v1283_v35 = vld [vmem:[%s2554_s21 + $0xf0] sm:$0xff] }
 0x34b   : > { %v1499_v20 = vadd.f32 %v1455_v36, %v1387_v50  ;;  %v1500_v4 = vadd.f32 %v1455_v36, %v1388_v54  ;;  %v1659_v28 = vadd.f32 %v1627_v12, %v1455_v36  ;;  %v1660_v17 = vadd.f32 %v1628_v52, %v1455_v36  ;;  %v1973_v52 = vld [vmem:[%s2554_s21 + $0x1f0] sm:$0xff] }
 0x34c   : > { %1561 = vst [vmem:[%s2554_s21 + $0xa0] sm:$0xff] %v1529_v46  ;;  %1562 = vst [vmem:[%s2554_s21 + $0xa8] sm:$0xff] %v1530_v0  ;;  %v1634_v26 = vmul.f32 %v1972_v10, %v2914_v43  ;;  %v1974_v46 = vld [vmem:[%s2554_s21 + $0x1f8] sm:$0xff] }
 0x34d   : > { %1995 = vst [vmem:[%s2554_s21 + $0x1a0] sm:$0xff] %v1689_v14  ;;  %1996 = vst [vmem:[%s2554_s21 + $0x1a8] sm:$0xff] %v1690_v15  ;;  %v1531_v45 = vmax.f32 %v1499_v20, 0.0  ;;  %v1532_v18 = vmax.f32 %v1500_v4, 0.0  ;;  %v1691_v30 = vmax.f32 %v1659_v28, 0.0  ;;  %v1692_v31 = vmax.f32 %v1660_v17, 0.0 }
 0x34e   : > { %v1284_v0 = vld [vmem:[%s2554_s21 + $0xf8] sm:$0xff]  ;;  %v1395_v14 = vmul.f32 %v2923_v11, %v1283_v35  ;;  %v1635_v15 = vmul.f32 %v1973_v52, %v2923_v11  ;;  %v1636_v36 = vmul.f32 %v1974_v46, %v2923_v11 }
 0x34f   : > { %1563 = vst [vmem:[%s2554_s21 + $0xb0] sm:$0xff] %v1531_v45  ;;  %1564 = vst [vmem:[%s2554_s21 + $0xb8] sm:$0xff] %v1532_v18  ;;  %v1396_v43 = vmul.f32 %v2923_v11, %v1284_v0 }
 0x350   : > { %1997 = vst [vmem:[%s2554_s21 + $0x1b0] sm:$0xff] %v1691_v30  ;;  %1998 = vst [vmem:[%s2554_s21 + $0x1b8] sm:$0xff] %v1692_v31 }
 0x357   : > { %v1460_v34 = vpop.permute.xlu0 %1459 }
 0x358   : > { %v1501_v48 = vadd.f32 %v1460_v34, %v1389_v25  ;;  %v1502_v40 = vadd.f32 %v1460_v34, %v1390_v13  ;;  %v1661_v38 = vadd.f32 %v1629_v1, %v1460_v34  ;;  %v1662_v41 = vadd.f32 %v1630_v44, %v1460_v34 }
 0x35a   : > { %v1533_v56 = vmax.f32 %v1501_v48, 0.0  ;;  %v1534_v60 = vmax.f32 %v1502_v40, 0.0  ;;  %v1693_v22 = vmax.f32 %v1661_v38, 0.0  ;;  %v1694_v6 = vmax.f32 %v1662_v41, 0.0  ;;  %v1465_v9 = vpop.permute.xlu1 %1464 }
 0x35b   : > { %v1503_v2 = vadd.f32 %v1465_v9, %v1391_v21  ;;  %v1504_v16 = vadd.f32 %v1465_v9, %v1392_v58  ;;  %v1663_v33 = vadd.f32 %v1631_v5, %v1465_v9  ;;  %v1664_v32 = vadd.f32 %v1632_v59, %v1465_v9 }
 0x35c   : > { %1565 = vst [vmem:[%s2554_s21 + $0xc0] sm:$0xff] %v1533_v56  ;;  %1566 = vst [vmem:[%s2554_s21 + $0xc8] sm:$0xff] %v1534_v60 }
 0x35d   : > { %1999 = vst [vmem:[%s2554_s21 + $0x1c0] sm:$0xff] %v1693_v22  ;;  %2000 = vst [vmem:[%s2554_s21 + $0x1c8] sm:$0xff] %v1694_v6  ;;  %v1535_v62 = vmax.f32 %v1503_v2, 0.0  ;;  %v1536_v3 = vmax.f32 %v1504_v16, 0.0  ;;  %v1695_v49 = vmax.f32 %v1663_v33, 0.0  ;;  %v1696_v53 = vmax.f32 %v1664_v32, 0.0 }
 0x35f   : > { %1567 = vst [vmem:[%s2554_s21 + $0xd0] sm:$0xff] %v1535_v62  ;;  %1568 = vst [vmem:[%s2554_s21 + $0xd8] sm:$0xff] %v1536_v3 }
 0x360   : > { %2001 = vst [vmem:[%s2554_s21 + $0x1d0] sm:$0xff] %v1695_v49  ;;  %2002 = vst [vmem:[%s2554_s21 + $0x1d8] sm:$0xff] %v1696_v53 }
 0x367   : > { %v1470_v57 = vpop.permute.xlu0 %1469 }
 0x368   : > { %v1505_v29 = vadd.f32 %v1470_v57, %v1393_v37  ;;  %v1506_v50 = vadd.f32 %v1470_v57, %v1394_v61  ;;  %v1665_v54 = vadd.f32 %v1633_v55, %v1470_v57  ;;  %v1666_v12 = vadd.f32 %v1634_v26, %v1470_v57 }
 0x36a   : > { %v1537_v20 = vmax.f32 %v1505_v29, 0.0  ;;  %v1538_v4 = vmax.f32 %v1506_v50, 0.0  ;;  %v1697_v28 = vmax.f32 %v1665_v54, 0.0  ;;  %v1698_v17 = vmax.f32 %v1666_v12, 0.0  ;;  %v1475_v45 = vpop.permute.xlu1 %1474 }
 0x36b   : > { %v1507_v18 = vadd.f32 %v1475_v45, %v1395_v14  ;;  %v1508_v30 = vadd.f32 %v1475_v45, %v1396_v43  ;;  %v1667_v31 = vadd.f32 %v1635_v15, %v1475_v45  ;;  %v1668_v23 = vadd.f32 %v1636_v36, %v1475_v45 }
 0x36c   : > { %1569 = vst [vmem:[%s2554_s21 + $0xe0] sm:$0xff] %v1537_v20  ;;  %1570 = vst [vmem:[%s2554_s21 + $0xe8] sm:$0xff] %v1538_v4 }
 0x36d   : > { %2003 = vst [vmem:[%s2554_s21 + $0x1e0] sm:$0xff] %v1697_v28  ;;  %2004 = vst [vmem:[%s2554_s21 + $0x1e8] sm:$0xff] %v1698_v17  ;;  %v1539_v19 = vmax.f32 %v1507_v18, 0.0  ;;  %v1540_v11 = vmax.f32 %v1508_v30, 0.0  ;;  %v1699_v24 = vmax.f32 %v1667_v31, 0.0  ;;  %v1700_v47 = vmax.f32 %v1668_v23, 0.0 }
 0x36f   : > { %1571 = vst [vmem:[%s2554_s21 + $0xf0] sm:$0xff] %v1539_v19  ;;  %1572 = vst [vmem:[%s2554_s21 + $0xf8] sm:$0xff] %v1540_v11 }
 0x370   : > { %2005 = vst [vmem:[%s2554_s21 + $0x1f0] sm:$0xff] %v1699_v24  ;;  %2006 = vst [vmem:[%s2554_s21 + $0x1f8] sm:$0xff] %v1700_v47 }
 0x371   : > { %s2015_s11 = sshll.u32 %s2299_s19, 12  ;;  %s1764_s13 = sshll.u32 %s2554_s21, 4  ;;  %s1765_s13 = int_to_ptr.vmem [resolvable:$true] %s1764_s13 }
 0x372   : > { %s1747_s9 = scalar_lea.hbm %s3148_s4, %s2015_s11  ;;  %s2247_s28 = smov 4096  }
 0x373   : > { %2022 = sst [smem:[#allocation9]] (%p2369_p12), %s2247_s28  ;;  %s2248_s12 = smov 8192  }
 0x374   : > { %2023 = sst [smem:[#allocation9 + $0x1]] (%p2369_p12), %s2248_s12  ;;  %s2249_s29 = smov 16  }
 0x375   : > { %2024 = sst [smem:[#allocation9 + $0x2]] (%p2369_p12), %s2249_s29  ;;  %s2250_s10 = smov 256  }
 0x376   : > { %2025 = sst [smem:[#allocation9 + $0x3]] (%p2369_p12), %s2250_s10  ;;  %s2251_s19 = smov [#allocation8]  }
 0x377   : > { %2026 = sst [smem:[#allocation9 + $0x4]] (%p2369_p12), %s2250_s10  ;;  %s2252_s21 = smov 0  }
 0x378   : > { %2027 = sst [smem:[#allocation9 + $0x5]] (%p2369_p12), %s2249_s29 }
 0x379   : > { %2028 = dma.general (%p2369_p12), %s1765_s13, 8192, %s1747_s9, %s1734_s25, %s2251_s19, [#allocation9], %s2252_s21, 0  }
 0x37a PF: > { %s1792_s20 = sand.u32 1, %s2224_s15   ;;  %p3163_p6 = scmp.ne.s32.totalorder %s3153_s22, 0 }
 0x37b   : > { %p3164_p8 = scmp.ge.s32.totalorder %s2236_s18, 2  ;;  %s1793_s6 = scalar_lea.sflag [#allocation4], %s1792_s20 }
 0x37d   : > { %p2039_p10 = pnand %p3164_p8, %p3163_p6 }
 0x37f   : > { %2219 = dma.done.wait (!%p2039_p10), %s1793_s6, 8192  }
 0x380   : > { %2221 = vsyncadd (!%p2039_p10), %s1793_s6, 4294959104  ;;  %p18_p13 = scmp.ge.s32.totalorder %s2334_s27, 4   ;;  %s3165_s15 = smov %s2228_s16 }
 0x381   : > { %s3166_s16 = smov %s2232_s17  ;;  %s3167_s17 = smov %s2365_s24 }
 0x382   : > { %s3168_s18 = smov %s2334_s27  ;;  %20 = sbr.rel (!%p18_p13) target bundleno = 6 (0x6), region = 97 }
 0x389   :  { %1798 = vsyncpa [#allocation3], 1 }
 0x38a   :  { %1800 = vsyncpa [#allocation3 + $0x1], 1 }
 0x38b   :  { %1801 = vsyncpa [#allocation6], 1 }
 0x38c   :  { %1803 = vsyncpa [#allocation6 + $0x1], 1 }
 0x38d   :  { %1804 = vsyncpa [#allocation4], 1 }
 0x38e   :  { %1806 = vsyncpa [#allocation4 + $0x1], 1 }

</bundles_post_ra>
